<compile_context>
chip_gen: v6e
topology: v6e:2x2x1
jax: 0.10.0
libtpu: 0.0.40
codegen_flags: <defaults>
</compile_context>

<pallas_src>
import jax
import jax.numpy as jnp
from jax.experimental import pallas as pl
from jax.experimental.pallas import tpu as pltpu

FEATURES = 16
IN_DIM = 28 * 28          # 784
HID = 512
LAT2 = 2 * FEATURES       # 32


def _round_up(n, m):
    return ((n + m - 1) // m) * m


def _cdiv(a, b):
    return -(-a // b)


def _vae_kernel(x_ref, eps_ref,
                w1_ref, b1_ref, w2_ref, b2_ref,
                w3_ref, b3_ref, w4_ref, b4_ref,
                rec_ref, ml_ref):
    bf16 = jnp.bfloat16
    x = x_ref[...].astype(bf16)                                          # (TB, 784)

    # encoder1 + relu  (bf16 MXU, f32 accumulate)
    h1 = jnp.dot(x, w1_ref[...], preferred_element_type=jnp.float32) + b1_ref[...]
    h1 = jnp.maximum(h1, 0.0)                                            # (TB, 512)

    # encoder2 -> single lane-dense slab [mu | log_var]
    h2 = jnp.dot(h1.astype(bf16), w2_ref[...],
                 preferred_element_type=jnp.float32) + b2_ref[...]       # (TB, 32)
    mu = h2[:, :FEATURES]
    log_var = h2[:, FEATURES:]

    # reparameterise: z = mu + eps * exp(0.5 * log_var)
    z = mu + eps_ref[...] * jnp.exp(0.5 * log_var)                       # (TB, 16)

    # decoder1 + relu
    h3 = jnp.dot(z.astype(bf16), w3_ref[...],
                 preferred_element_type=jnp.float32) + b3_ref[...]
    h3 = jnp.maximum(h3, 0.0)                                            # (TB, 512)

    # decoder2 + sigmoid  (sigmoid(x) = 0.5*tanh(0.5*x) + 0.5 : single EUP op)
    h4 = jnp.dot(h3.astype(bf16), w4_ref[...],
                 preferred_element_type=jnp.float32) + b4_ref[...]       # (TB, 784)
    rec_ref[...] = (0.5 * jnp.tanh(0.5 * h4) + 0.5).astype(rec_ref.dtype)

    ml_ref[...] = h2                                                     # (TB, 32)


def _choose_tile(B, max_batch_tile):
    """Pick (tile_rows, num_tiles) with <8 padded rows per tile; >=2 tiles when
    the batch is large enough so both v7x TensorCores get grid steps."""
    n_tiles = max(1, _cdiv(B, max_batch_tile))
    if n_tiles == 1 and B >= 16:
        n_tiles = 2
    tb = _round_up(_cdiv(B, n_tiles), 8)
    return tb, n_tiles


def linear_vae_forward(x, eps, params, *, max_batch_tile=512):
    """x: (B, 784) f32, eps: (B, 16) f32.
    Returns (reconstruction (bf16), mu (f32), log_var (f32))."""
    B = x.shape[0]
    w1, b1, w2, b2, w3, b3, w4, b4 = params

    tb, n_tiles = _choose_tile(B, max_batch_tile)
    b_pad = tb * n_tiles
    grid = (n_tiles,)

    if b_pad != B:
        x = jnp.pad(x, ((0, b_pad - B), (0, 0)))
        eps = jnp.pad(eps, ((0, b_pad - B), (0, 0)))

    def batch_spec(n):
        return pl.BlockSpec((tb, n), lambda i: (i, 0))

    def const_spec(r, c):
        # Constant block index -> weight DMA'd once, stays VMEM-resident.
        return pl.BlockSpec((r, c), lambda i: (0, 0))

    rec, mu_logvar = pl.pallas_call(
        _vae_kernel,
        out_shape=(
            jax.ShapeDtypeStruct((b_pad, IN_DIM), jnp.bfloat16),   # reconstruction
            jax.ShapeDtypeStruct((b_pad, LAT2), jnp.float32),      # [mu | log_var]
        ),
        grid=grid,
        in_specs=[
            batch_spec(IN_DIM),           # x
            batch_spec(FEATURES),         # eps
            const_spec(IN_DIM, HID),      # w1
            const_spec(1, HID),           # b1
            const_spec(HID, LAT2),        # w2
            const_spec(1, LAT2),          # b2
            const_spec(FEATURES, HID),    # w3
            const_spec(1, HID),           # b3
            const_spec(HID, IN_DIM),      # w4
            const_spec(1, IN_DIM),        # b4
        ],
        out_specs=(
            batch_spec(IN_DIM),
            batch_spec(LAT2),
        ),
        compiler_params=pltpu.CompilerParams(
            dimension_semantics=("parallel",),
            vmem_limit_bytes=48 << 20,    # tb=512 working set ~15-20 MiB dbl-buffered
        ),
    )(x, eps, w1, b1, w2, b2, w3, b3, w4, b4)

    if b_pad != B:
        rec = rec[:B]
    mu = mu_logvar[:B, :FEATURES]
    log_var = mu_logvar[:B, FEATURES:]
    return rec, mu, log_var


def init_params(key):
    """nn.Linear-style init; weights stored transposed (in, out) and cast to bf16."""
    ks = jax.random.split(key, 8)

    def linear(kw, kb, fan_in, fan_out):
        bound = 1.0 / jnp.sqrt(fan_in)
        w = jax.random.uniform(kw, (fan_in, fan_out), jnp.float32, -bound, bound)
        b = jax.random.uniform(kb, (1, fan_out), jnp.float32, -bound, bound)
        return w.astype(jnp.bfloat16), b

    w1, b1 = linear(ks[0], ks[1], IN_DIM, HID)       # encoder1
    w2, b2 = linear(ks[2], ks[3], HID, LAT2)         # encoder2
    w3, b3 = linear(ks[4], ks[5], FEATURES, HID)     # decoder1
    w4, b4 = linear(ks[6], ks[7], HID, IN_DIM)       # decoder2
    return (w1, b1, w2, b2, w3, b3, w4, b4)


def reference_forward(x, eps, params):
    """Pure-JAX reference mirroring the kernel's bf16-in / f32-accumulate matmuls."""
    w1, b1, w2, b2, w3, b3, w4, b4 = params
    bf16 = jnp.bfloat16

    def mm(a, w):
        return jnp.dot(a.astype(bf16), w, preferred_element_type=jnp.float32)

    h1 = jnp.maximum(mm(x, w1) + b1, 0.0)
    h2 = mm(h1, w2) + b2
    mu, log_var = h2[:, :FEATURES], h2[:, FEATURES:]
    z = mu + eps * jnp.exp(0.5 * log_var)
    h3 = jnp.maximum(mm(z, w3) + b3, 0.0)
    rec = jax.nn.sigmoid(mm(h3, w4) + b4)
    return rec, mu, log_var


if __name__ == "__main__":
    key = jax.random.PRNGKey(0)
    k_param, k_x, k_eps = jax.random.split(key, 3)

    B = 2
    params = init_params(k_param)
    x = jax.random.uniform(k_x, (B, IN_DIM), jnp.float32)       # MNIST-like input in [0,1)
    eps = jax.random.normal(k_eps, (B, FEATURES), jnp.float32)  # reparameterisation noise

    rec, mu, log_var = linear_vae_forward(x, eps, params)
    jax.block_until_ready((rec, mu, log_var))

    rec_r, mu_r, lv_r = reference_forward(x, eps, params)
    assert rec.shape == (B, IN_DIM) and mu.shape == (B, FEATURES) and log_var.shape == (B, FEATURES)
    assert jnp.allclose(rec.astype(jnp.float32), rec_r, atol=1e-2), "reconstruction mismatch"
    assert jnp.allclose(mu, mu_r, atol=5e-3), "mu mismatch"
    assert jnp.allclose(log_var, lv_r, atol=5e-3), "log_var mismatch"

    print("KERNEL_OK")
</pallas_src>

<mosaic_0001>
module attributes {stable_mosaic.version = 11 : i64} {
  func.func @_vae_kernel(%arg0: i32, %arg1: memref<8x784xf32, #tpu.memory_space<vmem>>, %arg2: memref<8x16xf32, #tpu.memory_space<vmem>>, %arg3: memref<784x512xbf16, #tpu.memory_space<vmem>>, %arg4: memref<1x512xf32, #tpu.memory_space<vmem>>, %arg5: memref<512x32xbf16, #tpu.memory_space<vmem>>, %arg6: memref<1x32xf32, #tpu.memory_space<vmem>>, %arg7: memref<16x512xbf16, #tpu.memory_space<vmem>>, %arg8: memref<1x512xf32, #tpu.memory_space<vmem>>, %arg9: memref<512x784xbf16, #tpu.memory_space<vmem>>, %arg10: memref<1x784xf32, #tpu.memory_space<vmem>>, %arg11: memref<8x784xbf16, #tpu.memory_space<vmem>>, %arg12: memref<8x32xf32, #tpu.memory_space<vmem>>) attributes {dimension_semantics = [#tpu.dimension_semantics<parallel>], iteration_bounds = array<i64: 1>, scalar_prefetch = 0 : i64, scratch_operands = 0 : i64, tpu.core_type = #tpu.core_type<tc>, window_params = [{transform_indices = @transform_0, window_bounds = array<i64: 8, 784>}, {transform_indices = @transform_1, window_bounds = array<i64: 8, 16>}, {pipeline_mode = #tpu.pipeline_mode<synchronous>, transform_indices = @transform_2, window_bounds = array<i64: 784, 512>}, {pipeline_mode = #tpu.pipeline_mode<synchronous>, transform_indices = @transform_3, window_bounds = array<i64: 1, 512>}, {pipeline_mode = #tpu.pipeline_mode<synchronous>, transform_indices = @transform_4, window_bounds = array<i64: 512, 32>}, {pipeline_mode = #tpu.pipeline_mode<synchronous>, transform_indices = @transform_5, window_bounds = array<i64: 1, 32>}, {pipeline_mode = #tpu.pipeline_mode<synchronous>, transform_indices = @transform_6, window_bounds = array<i64: 16, 512>}, {pipeline_mode = #tpu.pipeline_mode<synchronous>, transform_indices = @transform_7, window_bounds = array<i64: 1, 512>}, {pipeline_mode = #tpu.pipeline_mode<synchronous>, transform_indices = @transform_8, window_bounds = array<i64: 512, 784>}, {pipeline_mode = #tpu.pipeline_mode<synchronous>, transform_indices = @transform_9, window_bounds = array<i64: 1, 784>}, {transform_indices = @transform_10, window_bounds = array<i64: 8, 784>}, {transform_indices = @transform_11, window_bounds = array<i64: 8, 32>}]} {
    %c0 = arith.constant 0 : index
    %c0_0 = arith.constant 0 : index
    %0 = vector.load %arg1[%c0, %c0_0] : memref<8x784xf32, #tpu.memory_space<vmem>>, vector<8x784xf32>
    %1 = arith.truncf %0 : vector<8x784xf32> to vector<8x784xbf16>
    %c0_1 = arith.constant 0 : index
    %c0_2 = arith.constant 0 : index
    %2 = vector.load %arg3[%c0_1, %c0_2] : memref<784x512xbf16, #tpu.memory_space<vmem>>, vector<784x512xbf16>
    %cst = arith.constant dense<0.000000e+00> : vector<8x512xf32>
    %3 = tpu.matmul %1, %2, %cst {dimension_numbers = #tpu.dot_dimension_numbers<[1], [0], [0], [1], [0, 0, 1, 1], [], []>} : vector<8x784xbf16>, vector<784x512xbf16>, vector<8x512xf32> -> vector<8x512xf32>
    %c0_3 = arith.constant 0 : index
    %c0_4 = arith.constant 0 : index
    %4 = vector.load %arg4[%c0_3, %c0_4] : memref<1x512xf32, #tpu.memory_space<vmem>>, vector<1x512xf32>
    %5 = vector.broadcast %4 : vector<1x512xf32> to vector<8x512xf32>
    %6 = arith.addf %3, %5 : vector<8x512xf32>
    %cst_5 = arith.constant 0.000000e+00 : f32
    %7 = vector.broadcast %cst_5 : f32 to vector<8x512xf32>
    %8 = arith.maximumf %6, %7 : vector<8x512xf32>
    %9 = arith.truncf %8 : vector<8x512xf32> to vector<8x512xbf16>
    %c0_6 = arith.constant 0 : index
    %c0_7 = arith.constant 0 : index
    %10 = vector.load %arg5[%c0_6, %c0_7] : memref<512x32xbf16, #tpu.memory_space<vmem>>, vector<512x32xbf16>
    %cst_8 = arith.constant dense<0.000000e+00> : vector<8x32xf32>
    %11 = tpu.matmul %9, %10, %cst_8 {dimension_numbers = #tpu.dot_dimension_numbers<[1], [0], [0], [1], [0, 0, 1, 1], [], []>} : vector<8x512xbf16>, vector<512x32xbf16>, vector<8x32xf32> -> vector<8x32xf32>
    %c0_9 = arith.constant 0 : index
    %c0_10 = arith.constant 0 : index
    %12 = vector.load %arg6[%c0_9, %c0_10] : memref<1x32xf32, #tpu.memory_space<vmem>>, vector<1x32xf32>
    %13 = vector.broadcast %12 : vector<1x32xf32> to vector<8x32xf32>
    %14 = arith.addf %11, %13 : vector<8x32xf32>
    %15 = vector.extract_strided_slice %14 {offsets = [0, 0], sizes = [8, 16], strides = [1, 1]} : vector<8x32xf32> to vector<8x16xf32>
    %16 = vector.extract_strided_slice %14 {offsets = [0, 16], sizes = [8, 16], strides = [1, 1]} : vector<8x32xf32> to vector<8x16xf32>
    %c0_11 = arith.constant 0 : index
    %c0_12 = arith.constant 0 : index
    %17 = vector.load %arg2[%c0_11, %c0_12] : memref<8x16xf32, #tpu.memory_space<vmem>>, vector<8x16xf32>
    %cst_13 = arith.constant 5.000000e-01 : f32
    %18 = vector.broadcast %cst_13 : f32 to vector<8x16xf32>
    %19 = arith.mulf %18, %16 : vector<8x16xf32>
    %20 = math.exp %19 : vector<8x16xf32>
    %21 = arith.mulf %17, %20 : vector<8x16xf32>
    %22 = arith.addf %15, %21 : vector<8x16xf32>
    %23 = arith.truncf %22 : vector<8x16xf32> to vector<8x16xbf16>
    %c0_14 = arith.constant 0 : index
    %c0_15 = arith.constant 0 : index
    %24 = vector.load %arg7[%c0_14, %c0_15] : memref<16x512xbf16, #tpu.memory_space<vmem>>, vector<16x512xbf16>
    %cst_16 = arith.constant dense<0.000000e+00> : vector<8x512xf32>
    %25 = tpu.matmul %23, %24, %cst_16 {dimension_numbers = #tpu.dot_dimension_numbers<[1], [0], [0], [1], [0, 0, 1, 1], [], []>} : vector<8x16xbf16>, vector<16x512xbf16>, vector<8x512xf32> -> vector<8x512xf32>
    %c0_17 = arith.constant 0 : index
    %c0_18 = arith.constant 0 : index
    %26 = vector.load %arg8[%c0_17, %c0_18] : memref<1x512xf32, #tpu.memory_space<vmem>>, vector<1x512xf32>
    %27 = vector.broadcast %26 : vector<1x512xf32> to vector<8x512xf32>
    %28 = arith.addf %25, %27 : vector<8x512xf32>
    %cst_19 = arith.constant 0.000000e+00 : f32
    %29 = vector.broadcast %cst_19 : f32 to vector<8x512xf32>
    %30 = arith.maximumf %28, %29 : vector<8x512xf32>
    %31 = arith.truncf %30 : vector<8x512xf32> to vector<8x512xbf16>
    %c0_20 = arith.constant 0 : index
    %c0_21 = arith.constant 0 : index
    %32 = vector.load %arg9[%c0_20, %c0_21] : memref<512x784xbf16, #tpu.memory_space<vmem>>, vector<512x784xbf16>
    %cst_22 = arith.constant dense<0.000000e+00> : vector<8x784xf32>
    %33 = tpu.matmul %31, %32, %cst_22 {dimension_numbers = #tpu.dot_dimension_numbers<[1], [0], [0], [1], [0, 0, 1, 1], [], []>} : vector<8x512xbf16>, vector<512x784xbf16>, vector<8x784xf32> -> vector<8x784xf32>
    %c0_23 = arith.constant 0 : index
    %c0_24 = arith.constant 0 : index
    %34 = vector.load %arg10[%c0_23, %c0_24] : memref<1x784xf32, #tpu.memory_space<vmem>>, vector<1x784xf32>
    %35 = vector.broadcast %34 : vector<1x784xf32> to vector<8x784xf32>
    %36 = arith.addf %33, %35 : vector<8x784xf32>
    %cst_25 = arith.constant 5.000000e-01 : f32
    %37 = vector.broadcast %cst_25 : f32 to vector<8x784xf32>
    %38 = arith.mulf %37, %36 : vector<8x784xf32>
    %39 = math.tanh %38 : vector<8x784xf32>
    %cst_26 = arith.constant 5.000000e-01 : f32
    %40 = vector.broadcast %cst_26 : f32 to vector<8x784xf32>
    %41 = arith.mulf %40, %39 : vector<8x784xf32>
    %cst_27 = arith.constant 5.000000e-01 : f32
    %42 = vector.broadcast %cst_27 : f32 to vector<8x784xf32>
    %43 = arith.addf %41, %42 : vector<8x784xf32>
    %44 = arith.truncf %43 : vector<8x784xf32> to vector<8x784xbf16>
    %c0_28 = arith.constant 0 : index
    %c0_29 = arith.constant 0 : index
    %45 = vector.load %arg11[%c0_28, %c0_29] : memref<8x784xbf16, #tpu.memory_space<vmem>>, vector<8x784xbf16>
    tpu.vector_store %arg11[%c0_28, %c0_29], %44 {strides = array<i32>} : memref<8x784xbf16, #tpu.memory_space<vmem>>, vector<8x784xbf16>,
    %c0_30 = arith.constant 0 : index
    %c0_31 = arith.constant 0 : index
    %46 = vector.load %arg12[%c0_30, %c0_31] : memref<8x32xf32, #tpu.memory_space<vmem>>, vector<8x32xf32>
    tpu.vector_store %arg12[%c0_30, %c0_31], %14 {strides = array<i32>} : memref<8x32xf32, #tpu.memory_space<vmem>>, vector<8x32xf32>,
    return
  }
  func.func @transform_0(%arg0: i32) -> (i32, i32) {
    %c0_i32 = arith.constant 0 : i32
    %c0_i32_0 = arith.constant 0 : i32
    return %arg0, %c0_i32 : i32, i32
  }
  func.func @transform_1(%arg0: i32) -> (i32, i32) {
    %c0_i32 = arith.constant 0 : i32
    %c0_i32_0 = arith.constant 0 : i32
    return %arg0, %c0_i32 : i32, i32
  }
  func.func @transform_2(%arg0: i32) -> (i32, i32) {
    %c0_i32 = arith.constant 0 : i32
    %c0_i32_0 = arith.constant 0 : i32
    %c0_i32_1 = arith.constant 0 : i32
    return %c0_i32, %c0_i32_0 : i32, i32
  }
  func.func @transform_3(%arg0: i32) -> (i32, i32) {
    %c0_i32 = arith.constant 0 : i32
    %c0_i32_0 = arith.constant 0 : i32
    %c0_i32_1 = arith.constant 0 : i32
    return %c0_i32, %c0_i32_0 : i32, i32
  }
  func.func @transform_4(%arg0: i32) -> (i32, i32) {
    %c0_i32 = arith.constant 0 : i32
    %c0_i32_0 = arith.constant 0 : i32
    %c0_i32_1 = arith.constant 0 : i32
    return %c0_i32, %c0_i32_0 : i32, i32
  }
  func.func @transform_5(%arg0: i32) -> (i32, i32) {
    %c0_i32 = arith.constant 0 : i32
    %c0_i32_0 = arith.constant 0 : i32
    %c0_i32_1 = arith.constant 0 : i32
    return %c0_i32, %c0_i32_0 : i32, i32
  }
  func.func @transform_6(%arg0: i32) -> (i32, i32) {
    %c0_i32 = arith.constant 0 : i32
    %c0_i32_0 = arith.constant 0 : i32
    %c0_i32_1 = arith.constant 0 : i32
    return %c0_i32, %c0_i32_0 : i32, i32
  }
  func.func @transform_7(%arg0: i32) -> (i32, i32) {
    %c0_i32 = arith.constant 0 : i32
    %c0_i32_0 = arith.constant 0 : i32
    %c0_i32_1 = arith.constant 0 : i32
    return %c0_i32, %c0_i32_0 : i32, i32
  }
  func.func @transform_8(%arg0: i32) -> (i32, i32) {
    %c0_i32 = arith.constant 0 : i32
    %c0_i32_0 = arith.constant 0 : i32
    %c0_i32_1 = arith.constant 0 : i32
    return %c0_i32, %c0_i32_0 : i32, i32
  }
  func.func @transform_9(%arg0: i32) -> (i32, i32) {
    %c0_i32 = arith.constant 0 : i32
    %c0_i32_0 = arith.constant 0 : i32
    %c0_i32_1 = arith.constant 0 : i32
    return %c0_i32, %c0_i32_0 : i32, i32
  }
  func.func @transform_10(%arg0: i32) -> (i32, i32) {
    %c0_i32 = arith.constant 0 : i32
    %c0_i32_0 = arith.constant 0 : i32
    return %arg0, %c0_i32 : i32, i32
  }
  func.func @transform_11(%arg0: i32) -> (i32, i32) {
    %c0_i32 = arith.constant 0 : i32
    %c0_i32_0 = arith.constant 0 : i32
    return %arg0, %c0_i32 : i32, i32
  }
}

</mosaic_0001>

<bundles_post_ra>
// kernel: tpu_custom_call.1
= control target key start
LH: loop header
LB: loop body
LE: loop exit
PB: predicated region body
PF: predicated region fallthrough
CT: control target
= control target key end

     0   :  { %17 = vsyncpa [#allocation3], 0  ;;  %vm1252_vm0 = vcmask 130048   ;;  %s6793_s0 = inlined_call_operand.vmem [shape: f32[8,784], index: 0, kind: input, shape index: {}]   ;;  %s6794_s1 = inlined_call_operand.vmem [shape: f32[8,16], index: 1, kind: input, shape index: {}]   ;;  %s6795_s2 = inlined_call_operand.vmem [shape: bf16[784,512], index: 2, kind: input, shape index: {}]   ;;  %s6796_s3 = inlined_call_operand.vmem [shape: f32[1,512], index: 3, kind: input, shape index: {}]   ;;  %s6797_s4 = inlined_call_operand.vmem [shape: bf16[512,32], index: 4, kind: input, shape index: {}]   ;;  %s6798_s5 = inlined_call_operand.vmem [shape: f32[1,32], index: 5, kind: input, shape index: {}]   ;;  %s6799_s6 = inlined_call_operand.vmem [shape: bf16[16,512], index: 6, kind: input, shape index: {}]   ;;  %s6800_s7 = inlined_call_operand.vmem [shape: f32[1,512], index: 7, kind: input, shape index: {}]   ;;  %s6801_s8 = inlined_call_operand.vmem [shape: bf16[512,784], index: 8, kind: input, shape index: {}]   ;;  %s6802_s9 = inlined_call_operand.vmem [shape: f32[1,784], index: 9, kind: input, shape index: {}]   ;;  %s6803_s10 = inlined_call_operand.hbm [shape: bf16[8,784], index: 10, kind: output, shape index: {0}]   ;;  %s6804_s11 = inlined_call_operand.hbm [shape: f32[8,32], index: 11, kind: output, shape index: {1}]  }
   0x1   :  { %v4509_v0 = vld [vmem:[%s6795_s2 + $0xe4] ss:$16 sps:$4 sm:$0xff]   ;;  %v4513_v2 = vld [vmem:[%s6795_s2 + $0xe0] ss:$16 sps:$4 sm:$0xff]   ;;  %v41_v46 = vld [vmem:[%s6793_s0 + $0x8] sm:$0xff] }
   0x2   :  { %v4511_v1 = vld [vmem:[%s6795_s2 + $0x2e4] ss:$16 sps:$4 sm:$0xff]   ;;  %1256 = vmatprep.subr.bf16.mxu0 %v4509_v0  ;;  %v4514_v3 = vld [vmem:[%s6795_s2 + $0x2e0] ss:$16 sps:$4 sm:$0xff]   ;;  %v5432_v49 = vpack.c.bf16 %v41_v46, %v41_v46  ;;  %v43_v50 = vld [vmem:[%s6793_s0 + $0x18] sm:$0xff] }
   0x3   :  { %1297 = vmatprep.subr.bf16.mxu1 %v4511_v1  ;;  %v4515_v4 = vld [vmem:[%s6795_s2 + $0xc4] ss:$16 sps:$4 sm:$0xff]   ;;  %1257 = vmatpush1.bf16.msra.mxu0 %v4513_v2  ;;  %v4519_v6 = vld [vmem:[%s6795_s2 + $0xc0] ss:$16 sps:$4 sm:$0xff]   ;;  %v5440_v52 = vpack.c.bf16 %v43_v50, %v43_v50 }
   0x4   :  { %1298 = vmatpush1.bf16.msra.mxu1 %v4514_v3  ;;  %v4517_v5 = vld [vmem:[%s6795_s2 + $0x2c4] ss:$16 sps:$4 sm:$0xff]   ;;  %1258 = vmatprep.subr.bf16.mxu0 %v4515_v4  ;;  %v4520_v7 = vld [vmem:[%s6795_s2 + $0x2c0] ss:$16 sps:$4 sm:$0xff]  }
   0x5   :  { %1299 = vmatprep.subr.bf16.mxu1 %v4517_v5  ;;  %v4521_v8 = vld [vmem:[%s6795_s2 + $0xa4] ss:$16 sps:$4 sm:$0xff]   ;;  %v4525_v10 = vld [vmem:[%s6795_s2 + $0xa0] ss:$16 sps:$4 sm:$0xff]   ;;  %1288 = vmatprep.mubr.bf16.mxu0 %v5432_v49 }
   0x6   :  { %v4523_v9 = vld [vmem:[%s6795_s2 + $0x2a4] ss:$16 sps:$4 sm:$0xff]   ;;  %v4526_v11 = vld [vmem:[%s6795_s2 + $0x2a0] ss:$16 sps:$4 sm:$0xff]   ;;  %1329 = vmatprep.mubr.bf16.mxu1 %v5440_v52 }
   0x7   :  { %1259 = vmatpush1.bf16.msra.mxu0 %v4519_v6  ;;  %v4527_v12 = vld [vmem:[%s6795_s2 + $0x84] ss:$16 sps:$4 sm:$0xff]   ;;  %v4531_v14 = vld [vmem:[%s6795_s2 + $0x80] ss:$16 sps:$4 sm:$0xff]  }
   0x8   :  { %1300 = vmatpush1.bf16.msra.mxu1 %v4520_v7  ;;  %1260 = vmatprep.subr.bf16.mxu0 %v4521_v8  ;;  %v4529_v13 = vld [vmem:[%s6795_s2 + $0x284] ss:$16 sps:$4 sm:$0xff]   ;;  %v4532_v15 = vld [vmem:[%s6795_s2 + $0x280] ss:$16 sps:$4 sm:$0xff]  }
   0x9   :  { %1301 = vmatprep.subr.bf16.mxu1 %v4523_v9  ;;  %v4533_v16 = vld [vmem:[%s6795_s2 + $0x64] ss:$16 sps:$4 sm:$0xff]   ;;  %v4537_v18 = vld [vmem:[%s6795_s2 + $0x60] ss:$16 sps:$4 sm:$0xff]  }
   0xa   :  { %v4535_v17 = vld [vmem:[%s6795_s2 + $0x264] ss:$16 sps:$4 sm:$0xff]   ;;  %v4538_v19 = vld [vmem:[%s6795_s2 + $0x260] ss:$16 sps:$4 sm:$0xff]  }
   0xb   :  { %1261 = vmatpush1.bf16.msra.mxu0 %v4525_v10  ;;  %v4539_v20 = vld [vmem:[%s6795_s2 + $0x44] ss:$16 sps:$4 sm:$0xff]   ;;  %v4543_v22 = vld [vmem:[%s6795_s2 + $0x40] ss:$16 sps:$4 sm:$0xff]  }
   0xc   :  { %1302 = vmatpush1.bf16.msra.mxu1 %v4526_v11  ;;  %1262 = vmatprep.subr.bf16.mxu0 %v4527_v12  ;;  %v4541_v21 = vld [vmem:[%s6795_s2 + $0x244] ss:$16 sps:$4 sm:$0xff]   ;;  %v4544_v23 = vld [vmem:[%s6795_s2 + $0x240] ss:$16 sps:$4 sm:$0xff]  }
   0xd   :  { %1303 = vmatprep.subr.bf16.mxu1 %v4529_v13  ;;  %v4545_v24 = vld [vmem:[%s6795_s2 + $0x24] ss:$16 sps:$4 sm:$0xff]   ;;  %v4549_v26 = vld [vmem:[%s6795_s2 + $0x20] ss:$16 sps:$4 sm:$0xff]   ;;  %v4616_v13 = vld [vmem:[%s6795_s2 + $0xec] ss:$16 sps:$4 sm:$0xff]  }
   0xe   :  { %v4547_v25 = vld [vmem:[%s6795_s2 + $0x224] ss:$16 sps:$4 sm:$0xff]   ;;  %v4550_v27 = vld [vmem:[%s6795_s2 + $0x220] ss:$16 sps:$4 sm:$0xff]  }
   0xf   :  { %1263 = vmatpush1.bf16.msra.mxu0 %v4531_v14  ;;  %v4551_v28 = vld [vmem:[%s6795_s2 + $0x4] ss:$16 sps:$4 sm:$0xff]   ;;  %v4555_v30 = vld [vmem:[%s6795_s2] ss:$16 sps:$4 sm:$0xff]  }
  0x10   :  { %1304 = vmatpush1.bf16.msra.mxu1 %v4532_v15  ;;  %1264 = vmatprep.subr.bf16.mxu0 %v4533_v16  ;;  %v4553_v29 = vld [vmem:[%s6795_s2 + $0x204] ss:$16 sps:$4 sm:$0xff]   ;;  %v4556_v31 = vld [vmem:[%s6795_s2 + $0x200] ss:$16 sps:$4 sm:$0xff]   ;;  %v5221_v16 = vmov 0  }
  0x11   :  { %1305 = vmatprep.subr.bf16.mxu1 %v4535_v17  ;;  %v4557_v32 = vld [vmem:[%s6795_s2 + $0x1e4] ss:$16 sps:$4 sm:$0xff]   ;;  %v4561_v34 = vld [vmem:[%s6795_s2 + $0x1e0] ss:$16 sps:$4 sm:$0xff]  }
  0x12   :  { %v4559_v33 = vld [vmem:[%s6795_s2 + $0x3e4] ss:$16 sps:$4 sm:$0xff]   ;;  %v4562_v35 = vld [vmem:[%s6795_s2 + $0x3e0] ss:$16 sps:$4 sm:$0xff]  }
  0x13   :  { %1265 = vmatpush1.bf16.msra.mxu0 %v4537_v18  ;;  %v4563_v36 = vld [vmem:[%s6795_s2 + $0x1c4] ss:$16 sps:$4 sm:$0xff]   ;;  %v4567_v38 = vld [vmem:[%s6795_s2 + $0x1c0] ss:$16 sps:$4 sm:$0xff]   ;;  %v4614_v18 = vld [vmem:[%s6795_s2 + $0xe8] ss:$16 sps:$4 sm:$0xff]  }
  0x14   :  { %1306 = vmatpush1.bf16.msra.mxu1 %v4538_v19  ;;  %1266 = vmatprep.subr.bf16.mxu0 %v4539_v20  ;;  %v4565_v37 = vld [vmem:[%s6795_s2 + $0x3c4] ss:$16 sps:$4 sm:$0xff]   ;;  %v4568_v39 = vld [vmem:[%s6795_s2 + $0x3c0] ss:$16 sps:$4 sm:$0xff]  }
  0x15   :  { %1307 = vmatprep.subr.bf16.mxu1 %v4541_v21  ;;  %v4569_v40 = vld [vmem:[%s6795_s2 + $0x1a4] ss:$16 sps:$4 sm:$0xff]   ;;  %v4573_v42 = vld [vmem:[%s6795_s2 + $0x1a0] ss:$16 sps:$4 sm:$0xff]   ;;  %v4622_v21 = vld [vmem:[%s6795_s2 + $0xcc] ss:$16 sps:$4 sm:$0xff]  }
  0x16   :  { %v4571_v41 = vld [vmem:[%s6795_s2 + $0x3a4] ss:$16 sps:$4 sm:$0xff]   ;;  %v4574_v43 = vld [vmem:[%s6795_s2 + $0x3a0] ss:$16 sps:$4 sm:$0xff]  }
  0x17   :  { %1267 = vmatpush1.bf16.msra.mxu0 %v4543_v22  ;;  %v4575_v44 = vld [vmem:[%s6795_s2 + $0x184] ss:$16 sps:$4 sm:$0xff]   ;;  %v4579_v47 = vld [vmem:[%s6795_s2 + $0x180] ss:$16 sps:$4 sm:$0xff]  }
  0x18   :  { %1308 = vmatpush1.bf16.msra.mxu1 %v4544_v23  ;;  %1268 = vmatprep.subr.bf16.mxu0 %v4545_v24  ;;  %v4577_v45 = vld [vmem:[%s6795_s2 + $0x384] ss:$16 sps:$4 sm:$0xff]   ;;  %v4580_v48 = vld [vmem:[%s6795_s2 + $0x380] ss:$16 sps:$4 sm:$0xff]   ;;  %v4620_v23 = vld [vmem:[%s6795_s2 + $0xc8] ss:$16 sps:$4 sm:$0xff]  }
  0x19   :  { %1309 = vmatprep.subr.bf16.mxu1 %v4547_v25  ;;  %v4581_v51 = vld [vmem:[%s6795_s2 + $0x164] ss:$16 sps:$4 sm:$0xff]   ;;  %v4585_v54 = vld [vmem:[%s6795_s2 + $0x160] ss:$16 sps:$4 sm:$0xff]   ;;  %v4628_v25 = vld [vmem:[%s6795_s2 + $0xac] ss:$16 sps:$4 sm:$0xff]  }
  0x1a   :  { %v4583_v53 = vld [vmem:[%s6795_s2 + $0x364] ss:$16 sps:$4 sm:$0xff]   ;;  %v4586_v55 = vld [vmem:[%s6795_s2 + $0x360] ss:$16 sps:$4 sm:$0xff]  }
  0x1b   :  { %1269 = vmatpush1.bf16.msra.mxu0 %v4549_v26  ;;  %v4587_v56 = vld [vmem:[%s6795_s2 + $0x144] ss:$16 sps:$4 sm:$0xff]   ;;  %v4591_v58 = vld [vmem:[%s6795_s2 + $0x140] ss:$16 sps:$4 sm:$0xff]  }
  0x1c   :  { %1310 = vmatpush1.bf16.msra.mxu1 %v4550_v27  ;;  %1270 = vmatprep.subr.bf16.mxu0 %v4551_v28  ;;  %v4589_v57 = vld [vmem:[%s6795_s2 + $0x344] ss:$16 sps:$4 sm:$0xff]   ;;  %v4592_v59 = vld [vmem:[%s6795_s2 + $0x340] ss:$16 sps:$4 sm:$0xff]   ;;  %v4626_v27 = vld [vmem:[%s6795_s2 + $0xa8] ss:$16 sps:$4 sm:$0xff]  }
  0x1d   :  { %1311 = vmatprep.subr.bf16.mxu1 %v4553_v29  ;;  %v4593_v60 = vld [vmem:[%s6795_s2 + $0x124] ss:$16 sps:$4 sm:$0xff]   ;;  %v4597_v62 = vld [vmem:[%s6795_s2 + $0x120] ss:$16 sps:$4 sm:$0xff]   ;;  %v4634_v29 = vld [vmem:[%s6795_s2 + $0x8c] ss:$16 sps:$4 sm:$0xff]  }
  0x1e   :  { %v4595_v61 = vld [vmem:[%s6795_s2 + $0x324] ss:$16 sps:$4 sm:$0xff]   ;;  %v4598_v63 = vld [vmem:[%s6795_s2 + $0x320] ss:$16 sps:$4 sm:$0xff]  }
  0x1f   :  { %1271 = vmatpush1.bf16.msra.mxu0 %v4555_v30  ;;  %v4599_v0 = vld [vmem:[%s6795_s2 + $0x104] ss:$16 sps:$4 sm:$0xff]   ;;  %v4603_v2 = vld [vmem:[%s6795_s2 + $0x100] ss:$16 sps:$4 sm:$0xff]  }
  0x20   :  { %1312 = vmatpush1.bf16.msra.mxu1 %v4556_v31  ;;  %1272 = vmatprep.subr.bf16.mxu0 %v4557_v32  ;;  %v4601_v1 = vld [vmem:[%s6795_s2 + $0x304] ss:$16 sps:$4 sm:$0xff]   ;;  %v4604_v3 = vld [vmem:[%s6795_s2 + $0x300] ss:$16 sps:$4 sm:$0xff]   ;;  %v4632_v31 = vld [vmem:[%s6795_s2 + $0x88] ss:$16 sps:$4 sm:$0xff]  }
  0x21   :  { %1313 = vmatprep.subr.bf16.mxu1 %v4559_v33  ;;  %v40_v4 = vld [vmem:[%s6793_s0] sm:$0xff]  ;;  %v42_v5 = vld [vmem:[%s6793_s0 + $0x10] sm:$0xff]  ;;  %v4640_v33 = vld [vmem:[%s6795_s2 + $0x6c] ss:$16 sps:$4 sm:$0xff]  }
  0x22   :  { %v4607_v6 = vld [vmem:[%s6795_s2 + $0x4e4] ss:$16 sps:$4 sm:$0xff]   ;;  %v5501_v8 = vpack.c.bf16 %v40_v4, %v40_v4  ;;  %v5503_v9 = vpack.c.bf16 %v42_v5, %v42_v5  ;;  %v4605_v10 = vld [vmem:[%s6795_s2 + $0x4e0] ss:$16 sps:$4 sm:$0xff]   ;;  %v4688_v4 = vld [vmem:[%s6795_s2 + $0x16c] ss:$16 sps:$4 sm:$0xff]  }
  0x23   :  { %1273 = vmatpush2.bf16.msra.mxu0 %v4561_v34  ;;  %v4610_v7 = vld [vmem:[%s6795_s2 + $0x604] ss:$16 sps:$4 sm:$0xff]   ;;  %v4608_v11 = vld [vmem:[%s6795_s2 + $0x600] ss:$16 sps:$4 sm:$0xff]  }
  0x24   :  { %1314 = vmatpush2.bf16.msra.mxu1 %v4562_v35  ;;  %1274 = vmatprep.subr.bf16.mxu0 %v4563_v36  ;;  %v4613_v12 = vld [vmem:[%s6795_s2 + $0x4c4] ss:$16 sps:$4 sm:$0xff]   ;;  %v4611_v14 = vld [vmem:[%s6795_s2 + $0x4c0] ss:$16 sps:$4 sm:$0xff]   ;;  %v45_v35 = vld [vmem:[%s6793_s0 + $0x28] sm:$0xff] }
  0x25   :  { %1315 = vmatprep.subr.bf16.mxu1 %v4565_v37  ;;  %v46_v15 = vld [vmem:[%s6793_s0 + $0x30] sm:$0xff]  ;;  %v5585_v36 = vpack.c.bf16 %v45_v35, %v45_v35  ;;  %v4638_v37 = vld [vmem:[%s6795_s2 + $0x68] ss:$16 sps:$4 sm:$0xff]  }
  0x26   :  { %v4619_v17 = vld [vmem:[%s6795_s2 + $0x4a4] ss:$16 sps:$4 sm:$0xff]   ;;  %v5532_v19 = vpack.c.bf16 %v46_v15, %v46_v15  ;;  %v4617_v20 = vld [vmem:[%s6795_s2 + $0x4a0] ss:$16 sps:$4 sm:$0xff]   ;;  %v4722_v35 = vld [vmem:[%s6795_s2 + $0x4a8] ss:$16 sps:$4 sm:$0xff]  }
  0x27   :  { %1275 = vmatpush2.bf16.msra.mxu0 %v4567_v38  ;;  %v4625_v22 = vld [vmem:[%s6795_s2 + $0x484] ss:$16 sps:$4 sm:$0xff]   ;;  %v4623_v24 = vld [vmem:[%s6795_s2 + $0x480] ss:$16 sps:$4 sm:$0xff]  }
  0x28   :  { %1316 = vmatpush2.bf16.msra.mxu1 %v4568_v39  ;;  %1276 = vmatprep.subr.bf16.mxu0 %v4569_v40  ;;  %v4631_v26 = vld [vmem:[%s6795_s2 + $0x464] ss:$16 sps:$4 sm:$0xff]   ;;  %v4629_v28 = vld [vmem:[%s6795_s2 + $0x460] ss:$16 sps:$4 sm:$0xff]   ;;  %v4646_v39 = vld [vmem:[%s6795_s2 + $0x4c] ss:$16 sps:$4 sm:$0xff]  }
  0x29   :  { %1317 = vmatprep.subr.bf16.mxu1 %v4571_v41  ;;  %v4637_v30 = vld [vmem:[%s6795_s2 + $0x444] ss:$16 sps:$4 sm:$0xff]   ;;  %v4635_v32 = vld [vmem:[%s6795_s2 + $0x440] ss:$16 sps:$4 sm:$0xff]   ;;  %v4644_v41 = vld [vmem:[%s6795_s2 + $0x48] ss:$16 sps:$4 sm:$0xff]  }
  0x2a   :  { %v4643_v34 = vld [vmem:[%s6795_s2 + $0x424] ss:$16 sps:$4 sm:$0xff]   ;;  %v4641_v38 = vld [vmem:[%s6795_s2 + $0x420] ss:$16 sps:$4 sm:$0xff]  }
  0x2b   :  { %1277 = vmatpush2.bf16.msra.mxu0 %v4573_v42  ;;  %v4649_v40 = vld [vmem:[%s6795_s2 + $0x404] ss:$16 sps:$4 sm:$0xff]   ;;  %v4647_v42 = vld [vmem:[%s6795_s2 + $0x400] ss:$16 sps:$4 sm:$0xff]  }
  0x2c   :  { %1318 = vmatpush2.bf16.msra.mxu1 %v4574_v43  ;;  %1278 = vmatprep.subr.bf16.mxu0 %v4575_v44  ;;  %v4652_v43 = vld [vmem:[%s6795_s2 + $0x2c] ss:$16 sps:$4 sm:$0xff]   ;;  %v4655_v44 = vld [vmem:[%s6795_s2 + $0x5e4] ss:$16 sps:$4 sm:$0xff]   ;;  %v4653_v46 = vld [vmem:[%s6795_s2 + $0x5e0] ss:$16 sps:$4 sm:$0xff]  }
  0x2d   :  { %1319 = vmatprep.subr.bf16.mxu1 %v4577_v45  ;;  %v4650_v45 = vld [vmem:[%s6795_s2 + $0x28] ss:$16 sps:$4 sm:$0xff]   ;;  %v4659_v50 = vld [vmem:[%s6795_s2 + $0x5c0] ss:$16 sps:$4 sm:$0xff]   ;;  %v4691_v5 = vld [vmem:[%s6795_s2 + $0x524] ss:$16 sps:$4 sm:$0xff]  }
  0x2e   :  { %v44_v15 = vld [vmem:[%s6793_s0 + $0x20] sm:$0xff] }
  0x2f   :  { %1279 = vmatpush2.bf16.msra.mxu0 %v4579_v47  ;;  %v4658_v47 = vld [vmem:[%s6795_s2 + $0xc] ss:$16 sps:$4 sm:$0xff]  }
  0x30   :  { %1320 = vmatpush2.bf16.msra.mxu1 %v4580_v48  ;;  %1280 = vmatprep.subr.bf16.mxu0 %v4581_v51  ;;  %v4661_v48 = vld [vmem:[%s6795_s2 + $0x5c4] ss:$16 sps:$4 sm:$0xff]   ;;  %v4664_v51 = vld [vmem:[%s6795_s2 + $0x1ec] ss:$16 sps:$4 sm:$0xff]  }
  0x31   :  { %1321 = vmatprep.subr.bf16.mxu1 %v4583_v53  ;;  %v4667_v53 = vld [vmem:[%s6795_s2 + $0x5a4] ss:$16 sps:$4 sm:$0xff]  }
  0x33   :  { %1281 = vmatpush2.bf16.msra.mxu0 %v4585_v54  ;;  %v4662_v54 = vld [vmem:[%s6795_s2 + $0x1e8] ss:$16 sps:$4 sm:$0xff]  }
  0x34   :  { %1322 = vmatpush2.bf16.msra.mxu1 %v4586_v55  ;;  %1282 = vmatprep.subr.bf16.mxu0 %v4587_v56  ;;  %v4665_v55 = vld [vmem:[%s6795_s2 + $0x5a0] ss:$16 sps:$4 sm:$0xff]   ;;  %v4670_v56 = vld [vmem:[%s6795_s2 + $0x1cc] ss:$16 sps:$4 sm:$0xff]  }
  0x35   :  { %1323 = vmatprep.subr.bf16.mxu1 %v4589_v57  ;;  %v4673_v57 = vld [vmem:[%s6795_s2 + $0x584] ss:$16 sps:$4 sm:$0xff]  }
  0x37   :  { %1283 = vmatpush2.bf16.msra.mxu0 %v4591_v58  ;;  %v4668_v58 = vld [vmem:[%s6795_s2 + $0x1c8] ss:$16 sps:$4 sm:$0xff]  }
  0x38   :  { %1324 = vmatpush2.bf16.msra.mxu1 %v4592_v59  ;;  %1284 = vmatprep.subr.bf16.mxu0 %v4593_v60  ;;  %v4671_v59 = vld [vmem:[%s6795_s2 + $0x580] ss:$16 sps:$4 sm:$0xff]   ;;  %v4676_v60 = vld [vmem:[%s6795_s2 + $0x1ac] ss:$16 sps:$4 sm:$0xff]  }
  0x39   :  { %1325 = vmatprep.subr.bf16.mxu1 %v4595_v61  ;;  %v4679_v61 = vld [vmem:[%s6795_s2 + $0x564] ss:$16 sps:$4 sm:$0xff]  }
  0x3b   :  { %1285 = vmatpush2.bf16.msra.mxu0 %v4597_v62  ;;  %v4674_v62 = vld [vmem:[%s6795_s2 + $0x1a8] ss:$16 sps:$4 sm:$0xff]  }
  0x3c   :  { %1326 = vmatpush2.bf16.msra.mxu1 %v4598_v63  ;;  %1286 = vmatprep.subr.bf16.mxu0 %v4599_v0  ;;  %v4677_v63 = vld [vmem:[%s6795_s2 + $0x560] ss:$16 sps:$4 sm:$0xff]   ;;  %v4682_v0 = vld [vmem:[%s6795_s2 + $0x18c] ss:$16 sps:$4 sm:$0xff]  }
  0x3d   :  { %1327 = vmatprep.subr.bf16.mxu1 %v4601_v1  ;;  %v4685_v1 = vld [vmem:[%s6795_s2 + $0x544] ss:$16 sps:$4 sm:$0xff]  }
  0x3f   :  { %1287 = vmatpush2.bf16.msra.mxu0 %v4603_v2  ;;  %v4680_v2 = vld [vmem:[%s6795_s2 + $0x188] ss:$16 sps:$4 sm:$0xff]  }
  0x40   :  { %1328 = vmatpush2.bf16.msra.mxu1 %v4604_v3  ;;  %1338 = vmatprep.subr.bf16.mxu0 %v4607_v6  ;;  %v4683_v3 = vld [vmem:[%s6795_s2 + $0x540] ss:$16 sps:$4 sm:$0xff]   ;;  %v4686_v6 = vld [vmem:[%s6795_s2 + $0x168] ss:$16 sps:$4 sm:$0xff]  }
  0x41   :  { %1393 = vmatprep.subr.bf16.mxu1 %v4610_v7  ;;  %v4689_v7 = vld [vmem:[%s6795_s2 + $0x520] ss:$16 sps:$4 sm:$0xff]  }
  0x42   :  { %1289 = vmatmul.mubr.bf16.vlgmr.msra.gmra.mxu0 %v5501_v8 }
  0x43   :  { %1330 = vmatmul.mubr.bf16.vlgmr.msra.gmra.mxu1 %v5503_v9  ;;  %1339 = vmatpush1.bf16.msra.mxu0 %v4605_v10  ;;  %v4694_v10 = vld [vmem:[%s6795_s2 + $0x14c] ss:$16 sps:$4 sm:$0xff]  }
  0x44   :  { %1394 = vmatpush1.bf16.msra.mxu1 %v4608_v11  ;;  %1340 = vmatprep.subr.bf16.mxu0 %v4613_v12  ;;  %v4697_v11 = vld [vmem:[%s6795_s2 + $0x504] ss:$16 sps:$4 sm:$0xff]   ;;  %v4692_v12 = vld [vmem:[%s6795_s2 + $0x148] ss:$16 sps:$4 sm:$0xff]  }
  0x45   :  { %1411 = vmatprep.mubr.bf16.mxu1 %v5221_v16  ;;  %1420 = vmatprep.subr.bf16.mxu1 %v4616_v13  ;;  %v4695_v13 = vld [vmem:[%s6795_s2 + $0x500] ss:$16 sps:$4 sm:$0xff]  }
  0x46   :  { %1370 = vmatprep.mubr.bf16.mxu0 %v5585_v36 }
  0x47   :  { %1341 = vmatpush1.bf16.msra.mxu0 %v4611_v14  ;;  %v4700_v14 = vld [vmem:[%s6795_s2 + $0x12c] ss:$16 sps:$4 sm:$0xff]  }
  0x48   :  { %1342 = vmatprep.subr.bf16.mxu0 %v4619_v17  ;;  %v4703_v17 = vld [vmem:[%s6795_s2 + $0x2ec] ss:$16 sps:$4 sm:$0xff]  }
  0x4b   :  { %4144 = vmatmul.mubr.msk.bf16.vlgmr.msra.gmra.mxu1 %vm1252_vm0, %v5532_v19  ;;  %1343 = vmatpush1.bf16.msra.mxu0 %v4617_v20  ;;  %v5714_v20 = vpack.c.bf16 %v44_v15, %v44_v15  ;;  %v4790_v15 = vld [vmem:[%s6795_s2 + $0x54c] ss:$16 sps:$4 sm:$0xff]  }
  0x4c   :  { %1421 = vmatpush1.bf16.msra.mxu1 %v4614_v18  ;;  %1344 = vmatprep.subr.bf16.mxu0 %v4625_v22  ;;  %v4698_v18 = vld [vmem:[%s6795_s2 + $0x128] ss:$16 sps:$4 sm:$0xff]   ;;  %v4706_v22 = vld [vmem:[%s6795_s2 + $0x10c] ss:$16 sps:$4 sm:$0xff]  }
  0x4d   :  { %1422 = vmatprep.subr.bf16.mxu1 %v4622_v21  ;;  %1452 = vmatprep.mubr.bf16.mxu1 %v5432_v49  ;;  %v4656_v49 = vld [vmem:[%s6795_s2 + $0x8] ss:$16 sps:$4 sm:$0xff]  }
  0x4e   :  { %v4701_v21 = vld [vmem:[%s6795_s2 + $0x2e8] ss:$16 sps:$4 sm:$0xff]  }
  0x4f   :  { %1345 = vmatpush1.bf16.msra.mxu0 %v4623_v24  ;;  %v4704_v24 = vld [vmem:[%s6795_s2 + $0x108] ss:$16 sps:$4 sm:$0xff]  }
  0x50   :  { %1423 = vmatpush1.bf16.msra.mxu1 %v4620_v23  ;;  %1346 = vmatprep.subr.bf16.mxu0 %v4631_v26  ;;  %v4709_v23 = vld [vmem:[%s6795_s2 + $0x2cc] ss:$16 sps:$4 sm:$0xff]  }
  0x51   :  { %1424 = vmatprep.subr.bf16.mxu1 %v4628_v25  ;;  %v4707_v25 = vld [vmem:[%s6795_s2 + $0x2c8] ss:$16 sps:$4 sm:$0xff]   ;;  %v4712_v26 = vld [vmem:[%s6795_s2 + $0x4ec] ss:$16 sps:$4 sm:$0xff]  }
  0x53   :  { %1347 = vmatpush1.bf16.msra.mxu0 %v4629_v28  ;;  %v4710_v28 = vld [vmem:[%s6795_s2 + $0x4e8] ss:$16 sps:$4 sm:$0xff]  }
  0x54   :  { %1425 = vmatpush1.bf16.msra.mxu1 %v4626_v27  ;;  %1348 = vmatprep.subr.bf16.mxu0 %v4637_v30  ;;  %v4715_v27 = vld [vmem:[%s6795_s2 + $0x2ac] ss:$16 sps:$4 sm:$0xff]  }
  0x55   :  { %1426 = vmatprep.subr.bf16.mxu1 %v4634_v29  ;;  %v4713_v29 = vld [vmem:[%s6795_s2 + $0x2a8] ss:$16 sps:$4 sm:$0xff]   ;;  %v4718_v30 = vld [vmem:[%s6795_s2 + $0x4cc] ss:$16 sps:$4 sm:$0xff]  }
  0x57   :  { %1349 = vmatpush1.bf16.msra.mxu0 %v4635_v32  ;;  %v4716_v32 = vld [vmem:[%s6795_s2 + $0x4c8] ss:$16 sps:$4 sm:$0xff]  }
  0x58   :  { %1427 = vmatpush1.bf16.msra.mxu1 %v4632_v31  ;;  %1350 = vmatprep.subr.bf16.mxu0 %v4643_v34  ;;  %v4721_v31 = vld [vmem:[%s6795_s2 + $0x28c] ss:$16 sps:$4 sm:$0xff]  }
  0x59   :  { %1428 = vmatprep.subr.bf16.mxu1 %v4640_v33  ;;  %v4724_v33 = vld [vmem:[%s6795_s2 + $0x4ac] ss:$16 sps:$4 sm:$0xff]  }
  0x5a   :  { %v4727_v34 = vld [vmem:[%s6795_s2 + $0x26c] ss:$16 sps:$4 sm:$0xff]  }
  0x5b   :  { %1351 = vmatpush1.bf16.msra.mxu0 %v4641_v38  ;;  %v4733_v38 = vld [vmem:[%s6795_s2 + $0x24c] ss:$16 sps:$4 sm:$0xff]  }
  0x5c   :  { %1429 = vmatpush1.bf16.msra.mxu1 %v4638_v37  ;;  %1352 = vmatprep.subr.bf16.mxu0 %v4649_v40  ;;  %v4730_v37 = vld [vmem:[%s6795_s2 + $0x48c] ss:$16 sps:$4 sm:$0xff]  }
  0x5d   :  { %1430 = vmatprep.subr.bf16.mxu1 %v4646_v39  ;;  %v4728_v39 = vld [vmem:[%s6795_s2 + $0x488] ss:$16 sps:$4 sm:$0xff]   ;;  %v4736_v40 = vld [vmem:[%s6795_s2 + $0x46c] ss:$16 sps:$4 sm:$0xff]  }
  0x5f   :  { %1353 = vmatpush1.bf16.msra.mxu0 %v4647_v42  ;;  %v4734_v42 = vld [vmem:[%s6795_s2 + $0x468] ss:$16 sps:$4 sm:$0xff]  }
  0x60   :  { %1431 = vmatpush1.bf16.msra.mxu1 %v4644_v41  ;;  %1354 = vmatprep.subr.bf16.mxu0 %v4655_v44  ;;  %v4739_v41 = vld [vmem:[%s6795_s2 + $0x22c] ss:$16 sps:$4 sm:$0xff]  }
  0x61   :  { %1432 = vmatprep.subr.bf16.mxu1 %v4652_v43  ;;  %v4737_v43 = vld [vmem:[%s6795_s2 + $0x228] ss:$16 sps:$4 sm:$0xff]   ;;  %v4742_v44 = vld [vmem:[%s6795_s2 + $0x44c] ss:$16 sps:$4 sm:$0xff]  }
  0x63   :  { %1355 = vmatpush2.bf16.msra.mxu0 %v4653_v46  ;;  %v4740_v46 = vld [vmem:[%s6795_s2 + $0x448] ss:$16 sps:$4 sm:$0xff]  }
  0x64   :  { %1433 = vmatpush1.bf16.msra.mxu1 %v4650_v45  ;;  %1356 = vmatprep.subr.bf16.mxu0 %v4661_v48  ;;  %v4745_v45 = vld [vmem:[%s6795_s2 + $0x20c] ss:$16 sps:$4 sm:$0xff]  }
  0x65   :  { %1434 = vmatprep.subr.bf16.mxu1 %v4658_v47  ;;  %v4743_v47 = vld [vmem:[%s6795_s2 + $0x208] ss:$16 sps:$4 sm:$0xff]   ;;  %v4748_v48 = vld [vmem:[%s6795_s2 + $0x42c] ss:$16 sps:$4 sm:$0xff]  }
  0x67   :  { %1357 = vmatpush2.bf16.msra.mxu0 %v4659_v50  ;;  %v4746_v50 = vld [vmem:[%s6795_s2 + $0x428] ss:$16 sps:$4 sm:$0xff]  }
  0x68   :  { %1435 = vmatpush1.bf16.msra.mxu1 %v4656_v49  ;;  %1358 = vmatprep.subr.bf16.mxu0 %v4667_v53  ;;  %v4751_v49 = vld [vmem:[%s6795_s2 + $0x3ec] ss:$16 sps:$4 sm:$0xff]  }
  0x69   :  { %1436 = vmatprep.subr.bf16.mxu1 %v4664_v51  ;;  %v4749_v51 = vld [vmem:[%s6795_s2 + $0x3e8] ss:$16 sps:$4 sm:$0xff]   ;;  %v4754_v53 = vld [vmem:[%s6795_s2 + $0x40c] ss:$16 sps:$4 sm:$0xff]  }
  0x6b   :  { %1359 = vmatpush2.bf16.msra.mxu0 %v4665_v55  ;;  %v4752_v55 = vld [vmem:[%s6795_s2 + $0x408] ss:$16 sps:$4 sm:$0xff]  }
  0x6c   :  { %1437 = vmatpush2.bf16.msra.mxu1 %v4662_v54  ;;  %1360 = vmatprep.subr.bf16.mxu0 %v4673_v57  ;;  %v4757_v54 = vld [vmem:[%s6795_s2 + $0x3cc] ss:$16 sps:$4 sm:$0xff]  }
  0x6d   :  { %1438 = vmatprep.subr.bf16.mxu1 %v4670_v56  ;;  %v4755_v56 = vld [vmem:[%s6795_s2 + $0x3c8] ss:$16 sps:$4 sm:$0xff]   ;;  %v4760_v57 = vld [vmem:[%s6795_s2 + $0x5ec] ss:$16 sps:$4 sm:$0xff]  }
  0x6f   :  { %1361 = vmatpush2.bf16.msra.mxu0 %v4671_v59  ;;  %v4758_v59 = vld [vmem:[%s6795_s2 + $0x5e8] ss:$16 sps:$4 sm:$0xff]  }
  0x70   :  { %1439 = vmatpush2.bf16.msra.mxu1 %v4668_v58  ;;  %1362 = vmatprep.subr.bf16.mxu0 %v4679_v61  ;;  %v4763_v58 = vld [vmem:[%s6795_s2 + $0x3ac] ss:$16 sps:$4 sm:$0xff]  }
  0x71   :  { %1440 = vmatprep.subr.bf16.mxu1 %v4676_v60  ;;  %v4761_v60 = vld [vmem:[%s6795_s2 + $0x3a8] ss:$16 sps:$4 sm:$0xff]   ;;  %v4766_v61 = vld [vmem:[%s6795_s2 + $0x5cc] ss:$16 sps:$4 sm:$0xff]  }
  0x73   :  { %1363 = vmatpush2.bf16.msra.mxu0 %v4677_v63  ;;  %v4764_v63 = vld [vmem:[%s6795_s2 + $0x5c8] ss:$16 sps:$4 sm:$0xff]  }
  0x74   :  { %1441 = vmatpush2.bf16.msra.mxu1 %v4674_v62  ;;  %1364 = vmatprep.subr.bf16.mxu0 %v4685_v1  ;;  %v4769_v62 = vld [vmem:[%s6795_s2 + $0x38c] ss:$16 sps:$4 sm:$0xff]  }
  0x75   :  { %1442 = vmatprep.subr.bf16.mxu1 %v4682_v0  ;;  %v4767_v0 = vld [vmem:[%s6795_s2 + $0x388] ss:$16 sps:$4 sm:$0xff]   ;;  %v4772_v1 = vld [vmem:[%s6795_s2 + $0x5ac] ss:$16 sps:$4 sm:$0xff]  }
  0x77   :  { %1365 = vmatpush2.bf16.msra.mxu0 %v4683_v3  ;;  %v4770_v3 = vld [vmem:[%s6795_s2 + $0x5a8] ss:$16 sps:$4 sm:$0xff]  }
  0x78   :  { %1443 = vmatpush2.bf16.msra.mxu1 %v4680_v2  ;;  %1366 = vmatprep.subr.bf16.mxu0 %v4691_v5  ;;  %v4775_v2 = vld [vmem:[%s6795_s2 + $0x36c] ss:$16 sps:$4 sm:$0xff]  }
  0x79   :  { %1444 = vmatprep.subr.bf16.mxu1 %v4688_v4  ;;  %v4773_v4 = vld [vmem:[%s6795_s2 + $0x368] ss:$16 sps:$4 sm:$0xff]   ;;  %v4778_v5 = vld [vmem:[%s6795_s2 + $0x58c] ss:$16 sps:$4 sm:$0xff]  }
  0x7b   :  { %1367 = vmatpush2.bf16.msra.mxu0 %v4689_v7  ;;  %v4776_v7 = vld [vmem:[%s6795_s2 + $0x588] ss:$16 sps:$4 sm:$0xff]  }
  0x7c   :  { %1445 = vmatpush2.bf16.msra.mxu1 %v4686_v6  ;;  %1368 = vmatprep.subr.bf16.mxu0 %v4697_v11  ;;  %v4781_v6 = vld [vmem:[%s6795_s2 + $0x34c] ss:$16 sps:$4 sm:$0xff]  }
  0x7d   :  { %1446 = vmatprep.subr.bf16.mxu1 %v4694_v10  ;;  %v4779_v10 = vld [vmem:[%s6795_s2 + $0x348] ss:$16 sps:$4 sm:$0xff]   ;;  %v4784_v11 = vld [vmem:[%s6795_s2 + $0x56c] ss:$16 sps:$4 sm:$0xff]  }
  0x7f   :  { %1369 = vmatpush2.bf16.msra.mxu0 %v4695_v13  ;;  %v4782_v13 = vld [vmem:[%s6795_s2 + $0x568] ss:$16 sps:$4 sm:$0xff]  }
  0x80   :  { %1447 = vmatpush2.bf16.msra.mxu1 %v4692_v12  ;;  %1461 = vmatprep.subr.bf16.mxu0 %v4703_v17  ;;  %v4787_v12 = vld [vmem:[%s6795_s2 + $0x32c] ss:$16 sps:$4 sm:$0xff]  }
  0x81   :  { %1448 = vmatprep.subr.bf16.mxu1 %v4700_v14  ;;  %v4785_v14 = vld [vmem:[%s6795_s2 + $0x328] ss:$16 sps:$4 sm:$0xff]   ;;  %v4793_v17 = vld [vmem:[%s6795_s2 + $0x30c] ss:$16 sps:$4 sm:$0xff]  }
  0x82   :  { %1371 = vmatmul.mubr.bf16.vlgmr.msra.gmra.mxu0 %v5714_v20 }
  0x83   :  { %1462 = vmatpush1.bf16.msra.mxu0 %v4701_v21  ;;  %1493 = vmatprep.mubr.bf16.mxu0 %v5440_v52  ;;  %v4719_v52 = vld [vmem:[%s6795_s2 + $0x288] ss:$16 sps:$4 sm:$0xff]  }
  0x84   :  { %1449 = vmatpush2.bf16.msra.mxu1 %v4698_v18  ;;  %1463 = vmatprep.subr.bf16.mxu0 %v4709_v23  ;;  %v4788_v18 = vld [vmem:[%s6795_s2 + $0x548] ss:$16 sps:$4 sm:$0xff]   ;;  %v4799_v23 = vld [vmem:[%s6795_s2 + $0x60c] ss:$16 sps:$4 sm:$0xff]  }
  0x85   :  { %1450 = vmatprep.subr.bf16.mxu1 %v4706_v22  ;;  %v4791_v21 = vld [vmem:[%s6795_s2 + $0x308] ss:$16 sps:$4 sm:$0xff]   ;;  %v4796_v22 = vld [vmem:[%s6795_s2 + $0x52c] ss:$16 sps:$4 sm:$0xff]  }
  0x87   :  { %1464 = vmatpush1.bf16.msra.mxu0 %v4707_v25  ;;  %v4797_v25 = vld [vmem:[%s6795_s2 + $0x608] ss:$16 sps:$4 sm:$0xff]  }
  0x88   :  { %1451 = vmatpush2.bf16.msra.mxu1 %v4704_v24  ;;  %1465 = vmatprep.subr.bf16.mxu0 %v4715_v27  ;;  %v4794_v24 = vld [vmem:[%s6795_s2 + $0x528] ss:$16 sps:$4 sm:$0xff]  }
  0x89   :  { %1502 = vmatprep.subr.bf16.mxu1 %v4712_v26  ;;  %v4802_v26 = vld [vmem:[%s6795_s2 + $0x50c] ss:$16 sps:$4 sm:$0xff]  }
  0x8a   :  { %v4803_v27 = vld [vmem:[%s6797_s4 + $0x78] sm:$0xff]  }
  0x8b   :  { %1453 = vmatmul.mubr.bf16.vlgmr.msra.gmra.mxu1 %v5501_v8  ;;  %1466 = vmatpush1.bf16.msra.mxu0 %v4713_v29  ;;  %v4725_v8 = vld [vmem:[%s6795_s2 + $0x268] ss:$16 sps:$4 sm:$0xff]  }
  0x8c   :  { %1503 = vmatpush1.bf16.msra.mxu1 %v4710_v28  ;;  %1467 = vmatprep.subr.bf16.mxu0 %v4721_v31  ;;  %v4800_v28 = vld [vmem:[%s6795_s2 + $0x508] ss:$16 sps:$4 sm:$0xff]  }
  0x8d   :  { %1504 = vmatprep.subr.bf16.mxu1 %v4718_v30  ;;  %1534 = vmatprep.mubr.bf16.mxu1 %v5585_v36  ;;  %v4731_v36 = vld [vmem:[%s6795_s2 + $0x248] ss:$16 sps:$4 sm:$0xff]   ;;  %v4805_v30 = vld [vmem:[%s6797_s4 + $0x70] sm:$0xff]  }
  0x8e   :  { %v4804_v29 = vld [vmem:[%s6797_s4 + $0x38] sm:$0xff]   ;;  %v4807_v31 = vld [vmem:[%s6797_s4 + $0x68] sm:$0xff]  }
  0x8f   :  { %1468 = vmatpush1.bf16.msra.mxu0 %v4719_v52  ;;  %v4809_v52 = vld [vmem:[%s6797_s4 + $0x60] sm:$0xff]  }
  0x90   :  { %1505 = vmatpush1.bf16.msra.mxu1 %v4716_v32  ;;  %1469 = vmatprep.subr.bf16.mxu0 %v4727_v34  ;;  %v4808_v32 = vld [vmem:[%s6797_s4 + $0x28] sm:$0xff]   ;;  %v4810_v34 = vld [vmem:[%s6797_s4 + $0x20] sm:$0xff]  }
  0x91   :  { %1506 = vmatprep.subr.bf16.mxu1 %v4724_v33  ;;  %v4821_v33 = vld [vmem:[%s6797_s4 + $0xf0] sm:$0xff]  }
  0x93   :  { %1470 = vmatpush1.bf16.msra.mxu0 %v4725_v8  ;;  %v4811_v8 = vld [vmem:[%s6797_s4 + $0x58] sm:$0xff]  }
  0x94   :  { %1507 = vmatpush1.bf16.msra.mxu1 %v4722_v35  ;;  %1471 = vmatprep.subr.bf16.mxu0 %v4733_v38  ;;  %v4822_v35 = vld [vmem:[%s6797_s4 + $0xb0] sm:$0xff]   ;;  %v4812_v38 = vld [vmem:[%s6797_s4 + $0x18] sm:$0xff]  }
  0x95   :  { %1508 = vmatprep.subr.bf16.mxu1 %v4730_v37  ;;  %v4823_v37 = vld [vmem:[%s6797_s4 + $0xe8] sm:$0xff]  }
  0x97   :  { %1472 = vmatpush1.bf16.msra.mxu0 %v4731_v36  ;;  %v4813_v36 = vld [vmem:[%s6797_s4 + $0x50] sm:$0xff]  }
  0x98   :  { %1509 = vmatpush1.bf16.msra.mxu1 %v4728_v39  ;;  %1473 = vmatprep.subr.bf16.mxu0 %v4739_v41  ;;  %v4824_v39 = vld [vmem:[%s6797_s4 + $0xa8] sm:$0xff]   ;;  %v4814_v41 = vld [vmem:[%s6797_s4 + $0x10] sm:$0xff]  }
  0x99   :  { %1510 = vmatprep.subr.bf16.mxu1 %v4736_v40  ;;  %v4825_v40 = vld [vmem:[%s6797_s4 + $0xe0] sm:$0xff]  }
  0x9b   :  { %1474 = vmatpush1.bf16.msra.mxu0 %v4737_v43  ;;  %v4816_v43 = vld [vmem:[%s6797_s4 + $0x8] sm:$0xff]  }
  0x9c   :  { %1511 = vmatpush1.bf16.msra.mxu1 %v4734_v42  ;;  %1475 = vmatprep.subr.bf16.mxu0 %v4745_v45  ;;  %v4815_v42 = vld [vmem:[%s6797_s4 + $0x48] sm:$0xff]   ;;  %v4818_v45 = vld [vmem:[%s6797_s4] sm:$0xff]  }
  0x9d   :  { %1512 = vmatprep.subr.bf16.mxu1 %v4742_v44  ;;  %v4817_v44 = vld [vmem:[%s6797_s4 + $0x40] sm:$0xff]  }
  0x9f   :  { %1476 = vmatpush1.bf16.msra.mxu0 %v4743_v47 }
  0xa0   :  { %1513 = vmatpush1.bf16.msra.mxu1 %v4740_v46  ;;  %1477 = vmatprep.subr.bf16.mxu0 %v4751_v49 }
  0xa1   :  { %1514 = vmatprep.subr.bf16.mxu1 %v4748_v48 }
  0xa3   :  { %1478 = vmatpush2.bf16.msra.mxu0 %v4749_v51 }
  0xa4   :  { %1515 = vmatpush1.bf16.msra.mxu1 %v4746_v50  ;;  %1479 = vmatprep.subr.bf16.mxu0 %v4757_v54 }
  0xa5   :  { %1516 = vmatprep.subr.bf16.mxu1 %v4754_v53 }
  0xa7   :  { %1480 = vmatpush2.bf16.msra.mxu0 %v4755_v56 }
  0xa8   :  { %1517 = vmatpush1.bf16.msra.mxu1 %v4752_v55  ;;  %1481 = vmatprep.subr.bf16.mxu0 %v4763_v58 }
  0xa9   :  { %1518 = vmatprep.subr.bf16.mxu1 %v4760_v57 }
  0xab   :  { %1482 = vmatpush2.bf16.msra.mxu0 %v4761_v60 }
  0xac   :  { %1519 = vmatpush2.bf16.msra.mxu1 %v4758_v59  ;;  %1483 = vmatprep.subr.bf16.mxu0 %v4769_v62 }
  0xad   :  { %1520 = vmatprep.subr.bf16.mxu1 %v4766_v61 }
  0xaf   :  { %1484 = vmatpush2.bf16.msra.mxu0 %v4767_v0 }
  0xb0   :  { %1521 = vmatpush2.bf16.msra.mxu1 %v4764_v63  ;;  %1485 = vmatprep.subr.bf16.mxu0 %v4775_v2 }
  0xb1   :  { %1522 = vmatprep.subr.bf16.mxu1 %v4772_v1 }
  0xb3   :  { %1486 = vmatpush2.bf16.msra.mxu0 %v4773_v4 }
  0xb4   :  { %1523 = vmatpush2.bf16.msra.mxu1 %v4770_v3  ;;  %1487 = vmatprep.subr.bf16.mxu0 %v4781_v6 }
  0xb5   :  { %1524 = vmatprep.subr.bf16.mxu1 %v4778_v5 }
  0xb7   :  { %1488 = vmatpush2.bf16.msra.mxu0 %v4779_v10 }
  0xb8   :  { %1525 = vmatpush2.bf16.msra.mxu1 %v4776_v7  ;;  %1489 = vmatprep.subr.bf16.mxu0 %v4787_v12 }
  0xb9   :  { %1526 = vmatprep.subr.bf16.mxu1 %v4784_v11 }
  0xbb   :  { %1490 = vmatpush2.bf16.msra.mxu0 %v4785_v14 }
  0xbc   :  { %1527 = vmatpush2.bf16.msra.mxu1 %v4782_v13  ;;  %1491 = vmatprep.subr.bf16.mxu0 %v4793_v17 }
  0xbd   :  { %1528 = vmatprep.subr.bf16.mxu1 %v4790_v15 }
  0xbf   :  { %1492 = vmatpush2.bf16.msra.mxu0 %v4791_v21 }
  0xc0   :  { %1529 = vmatpush2.bf16.msra.mxu1 %v4788_v18  ;;  %1557 = vmatprep.subr.bf16.mxu0 %v4799_v23 }
  0xc1   :  { %1530 = vmatprep.subr.bf16.mxu1 %v4796_v22 }
  0xc2   :  { %1494 = vmatmul.mubr.bf16.vlgmr.msra.gmra.mxu0 %v5503_v9  ;;  %v4806_v9 = vld [vmem:[%s6797_s4 + $0x30] sm:$0xff]  }
  0xc3   :  { %1558 = vmatpush1.bf16.msra.mxu0 %v4797_v25  ;;  %1575 = vmatprep.mubr.bf16.mxu0 %v5221_v16 }
  0xc4   :  { %1531 = vmatpush2.bf16.msra.mxu1 %v4794_v24  ;;  %4417 = vmatprep.subr.bf16.mxu0 %v4803_v27 }
  0xc5   :  { %1532 = vmatprep.subr.bf16.mxu1 %v4802_v26 }
  0xc8   :  { %1533 = vmatpush2.bf16.msra.mxu1 %v4800_v28 }
  0xca   :  { %4145 = vmatmul.mubr.msk.bf16.vlgmr.msra.gmra.mxu0 %vm1252_vm0, %v5532_v19  ;;  %v4819_v19 = vld [vmem:[%s6797_s4 + $0xf8] sm:$0xff]  }
  0xcb   :  { %1535 = vmatmul.mubr.bf16.vlgmr.msra.gmra.mxu1 %v5714_v20  ;;  %4418 = vmatpush3.bf16.msra.mxu0 %v4804_v29  ;;  %v4820_v20 = vld [vmem:[%s6797_s4 + $0xb8] sm:$0xff]  }
  0xcc   :  { %4419 = vmatprep.subr.bf16.mxu0 %v4805_v30  ;;  %4439 = vmatprep.subr.bf16.mxu1 %v4819_v19 }
  0xcd   :  { %4440 = vmatpush3.bf16.msra.mxu1 %v4820_v20 }
  0xce   :  { %4441 = vmatprep.subr.bf16.mxu1 %v4821_v33 }
  0xcf   :  { %4420 = vmatpush3.bf16.msra.mxu0 %v4806_v9 }
  0xd0   :  { %4421 = vmatprep.subr.bf16.mxu0 %v4807_v31 }
  0xd1   :  { %4442 = vmatpush3.bf16.msra.mxu1 %v4822_v35 }
  0xd2   :  { %4443 = vmatprep.subr.bf16.mxu1 %v4823_v37 }
  0xd3   :  { %4422 = vmatpush3.bf16.msra.mxu0 %v4808_v32 }
  0xd4   :  { %4423 = vmatprep.subr.bf16.mxu0 %v4809_v52 }
  0xd5   :  { %4444 = vmatpush3.bf16.msra.mxu1 %v4824_v39 }
  0xd6   :  { %4445 = vmatprep.subr.bf16.mxu1 %v4825_v40 }
  0xd7   :  { %4424 = vmatpush3.bf16.msra.mxu0 %v4810_v34 }
  0xd8   :  { %4425 = vmatprep.subr.bf16.mxu0 %v4811_v8 }
  0xdb   :  { %4426 = vmatpush3.bf16.msra.mxu0 %v4812_v38 }
  0xdc   :  { %4427 = vmatprep.subr.bf16.mxu0 %v4813_v36 }
  0xdf   :  { %4428 = vmatpush3.bf16.msra.mxu0 %v4814_v41 }
  0xe0   :  { %4429 = vmatprep.subr.bf16.mxu0 %v4815_v42 }
  0xe3   :  { %4430 = vmatpush3.bf16.msra.mxu0 %v4816_v43 }
  0xe4   :  { %4431 = vmatprep.subr.bf16.mxu0 %v4817_v44 }
  0xe7   :  { %4432 = vmatpush3.bf16.msra.mxu0 %v4818_v45 }
  0xe8   :  { %18 = vsyncpa [#allocation5], 0  ;;  %v4826_v46 = vld [vmem:[%s6797_s4 + $0xa0] sm:$0xff]   ;;  %v4827_v51 = vld [vmem:[%s6797_s4 + $0xd8] sm:$0xff]   ;;  %v252_v4 = vlaneseq  ;;  %vm3918_vm1 = vcmask 261120   ;;  %s5222_s29 = smov 112  }
  0xe9   :  { %4446 = vmatpush3.bf16.msra.mxu1 %v4826_v46  ;;  %v4828_v53 = vld [vmem:[%s6797_s4 + $0x98] sm:$0xff]   ;;  %v4829_v58 = vld [vmem:[%s6797_s4 + $0xd0] sm:$0xff]   ;;  %v4831_v62 = vld [vmem:[%s6797_s4 + $0xc8] sm:$0xff]  }
  0xea   :  { %4447 = vmatprep.subr.bf16.mxu1 %v4827_v51  ;;  %v4830_v59 = vld [vmem:[%s6797_s4 + $0x90] sm:$0xff]   ;;  %v4832_v63 = vld [vmem:[%s6797_s4 + $0x88] sm:$0xff]   ;;  %v4833_v2 = vld [vmem:[%s6797_s4 + $0xc0] sm:$0xff]   ;;  %v6022_v5 = vshrl.u32 %v252_v4, 7 }
  0xeb   :  { %v4834_v3 = vld [vmem:[%s6797_s4 + $0x80] sm:$0xff]  }
  0xec   :  { %v6025_v6 = vsub.s32 0, %v6022_v5  ;;  %v250_v7 = vld [vmem:[%s6796_s3] sm:$0xf]  ;;  %v6031_v10 = vsub.s32 1, %v6022_v5  ;;  %v6037_v20 = vsub.s32 2, %v6022_v5  ;;  %v6040_v33 = vsub.s32 3, %v6022_v5 }
  0xed   :  { %4448 = vmatpush3.bf16.msra.mxu1 %v4828_v53 }
  0xee   :  { %4449 = vmatprep.subr.bf16.mxu1 %v4829_v58  ;;  %v255_v11 = vrot.slane %v250_v7, %v6025_v6  ;;  %v259_v12 = vrot.slane %v250_v7, %v6031_v10  ;;  %v263_v35 = vrot.slane %v250_v7, %v6037_v20  ;;  %v267_v37 = vrot.slane %v250_v7, %v6040_v33 }
  0xf1   :  { %4450 = vmatpush3.bf16.msra.mxu1 %v4830_v59 }
  0xf2   :  { %4451 = vmatprep.subr.bf16.mxu1 %v4831_v62 }
  0xf5   :  { %4452 = vmatpush3.bf16.msra.mxu1 %v4832_v63 }
  0xf6   :  { %4453 = vmatprep.subr.bf16.mxu1 %v4833_v2 }
  0xf9   :  { %4454 = vmatpush3.bf16.msra.mxu1 %v4834_v3  ;;  %v4146_v3 = vld [vmem:[%s6798_s5] ss:$0 sm:$0xff] }
 0x102   :  { %v1290_v47 = vpop.f32.mrf.mxu0 }
 0x103   :  { %v1331_v48 = vpop.f32.mrf.mxu1  ;;  %v1291_v13 = vadd.f32 %v1290_v47, %v255_v11 }
 0x104   :  { %v1292_v49 = vpop.f32.mrf.mxu0 }
 0x105   :  { %v1333_v50 = vpop.f32.mrf.mxu1  ;;  %v1293_v14 = vadd.f32 %v1292_v49, %v259_v12  ;;  %v1332_v15 = vadd.f32 %v1331_v48, %v1291_v13 }
 0x106   :  { %v1294_v54 = vpop.f32.mrf.mxu0 }
 0x107   :  { %v1335_v55 = vpop.f32.mrf.mxu1  ;;  %v1334_v18 = vadd.f32 %v1333_v50, %v1293_v14 }
 0x108   :  { %v1295_v56 = vpop.f32.mrf.mxu0 }
 0x109   :  { %v1336_v57 = vpop.f32.mrf.mxu1 }
 0x10b   :  { %v1413_v60 = vpop.f32.mrf.mxu1 }
 0x10d   :  { %v1415_v61 = vpop.f32.mrf.mxu1 }
 0x10f   :  { %v1417_v0 = vpop.f32.mrf.mxu1 }
 0x111   :  { %v1418_v1 = vpop.f32.mrf.mxu1 }
 0x142   :  { %v1372_v17 = vpop.f32.mrf.mxu0 }
 0x143   :  { %v1373_v21 = vadd.f32 %v1372_v17, %v1332_v15 }
 0x144   :  { %v1374_v22 = vpop.f32.mrf.mxu0 }
 0x145   :  { %v1414_v23 = vadd.f32 %v1413_v60, %v1373_v21  ;;  %v1375_v24 = vadd.f32 %v1374_v22, %v1334_v18  ;;  %v4835_v60 = vld [vmem:[%s6799_s6] ss:$16 sps:$4 sm:$0xff]   ;;  %v4840_v18 = vld [vmem:[%s6799_s6 + $0xc] ss:$16 sps:$4 sm:$0xff]   ;;  %v4838_v21 = vld [vmem:[%s6799_s6 + $0x8] ss:$16 sps:$4 sm:$0xff]  }
 0x146   :  { %v1376_v25 = vpop.f32.mrf.mxu0  ;;  %2050 = vmatprep.subr.bf16.mxu1 %v4840_v18  ;;  %v4843_v22 = vld [vmem:[%s6801_s8 + $0x18c] ss:$28 sps:$4 sm:$0xff]  }
 0x147   :  { %v1416_v26 = vadd.f32 %v1415_v61, %v1375_v24  ;;  %v1584_v27 = vmax.f32 %v1414_v23, 0.0  ;;  %v4837_v61 = vld [vmem:[%s6799_s6 + $0x4] ss:$16 sps:$4 sm:$0xff]   ;;  %v4846_v23 = vld [vmem:[%s6801_s8 + $0x50c] ss:$28 sps:$4 sm:$0xff]  }
 0x148   :  { %v1377_v28 = vpop.f32.mrf.mxu0  ;;  %2009 = vmatprep.subr.bf16.mxu0 %v4837_v61  ;;  %v1935_v25 = vld [vmem:[%s6794_s1] sm:$0xff] }
 0x149   :  { %v1585_v29 = vmax.f32 %v1416_v26, 0.0  ;;  %v1588_v31 = vpack.c.bf16 %v1584_v27, %v1584_v27  ;;  %v4892_v61 = vld [vmem:[%s6801_s8 + $0x6c8] ss:$28 sps:$4 sm:$0xff]  }
 0x14a   :  { %v4916_v18 = vld [vmem:[%s6801_s8 + $0x5e8] ss:$28 sps:$4 sm:$0xff]  }
 0x14b   :  { %v1454_v30 = vpop.f32.mrf.mxu1  ;;  %v1589_v9 = vpack.c.bf16 %v1585_v29, %v1585_v29  ;;  %v4841_v29 = vld [vmem:[%s6801_s8 + $0x188] ss:$28 sps:$4 sm:$0xff]  }
 0x14c   :  { %v1455_v39 = vadd.f32 %v1454_v30, %v263_v35  ;;  %v4844_v30 = vld [vmem:[%s6801_s8 + $0x508] ss:$28 sps:$4 sm:$0xff]   ;;  %v4858_v35 = vld [vmem:[%s6801_s8 + $0x49c] ss:$28 sps:$4 sm:$0xff]  }
 0x14d   :  { %v1456_v32 = vpop.f32.mrf.mxu1  ;;  %1887 = vmatprep.mubr.bf16.mxu0 %v1589_v9 }
 0x14e   :  { %1888 = vmatmul.mubr.bf16.vlgmr.msra.gmra.mxu0 %v1588_v31  ;;  %v1457_v40 = vadd.f32 %v1456_v32, %v267_v37  ;;  %v4849_v31 = vld [vmem:[%s6801_s8 + $0x154] ss:$28 sps:$4 sm:$0xff]  }
 0x14f   :  { %v1458_v52 = vpop.f32.mrf.mxu1  ;;  %2027 = vmatprep.mubr.bf16.mxu0 %v5221_v16  ;;  %2010 = vmatpush1.bf16.msra.mxu0 %v4835_v60  ;;  %v4852_v32 = vld [vmem:[%s6801_s8 + $0x4d4] ss:$28 sps:$4 sm:$0xff]   ;;  %v4889_v60 = vld [vmem:[%s6801_s8 + $0x348] ss:$28 sps:$4 sm:$0xff]  }
 0x150   :  { %3530 = vmatprep.subr.bf16.mxu0 %v4843_v22  ;;  %v4847_v52 = vld [vmem:[%s6801_s8 + $0x150] ss:$28 sps:$4 sm:$0xff]   ;;  %v4856_v37 = vld [vmem:[%s6801_s8 + $0x498] ss:$28 sps:$4 sm:$0xff]  }
 0x151   :  { %v1459_v19 = vpop.f32.mrf.mxu1  ;;  %v4924_v22 = vld [vmem:[%s6801_s8 + $0x5b4] ss:$28 sps:$4 sm:$0xff]  }
 0x152   :  { %v4850_v19 = vld [vmem:[%s6801_s8 + $0x4d0] ss:$28 sps:$4 sm:$0xff]  }
 0x182   :  { %v1495_v34 = vpop.f32.mrf.mxu0 }
 0x183   :  { %v1496_v41 = vadd.f32 %v1495_v34, %v1455_v39  ;;  %v4855_v34 = vld [vmem:[%s6801_s8 + $0x11c] ss:$28 sps:$4 sm:$0xff]   ;;  %v4864_v39 = vld [vmem:[%s6801_s8 + $0x464] ss:$28 sps:$4 sm:$0xff]  }
 0x184   :  { %v1497_v8 = vpop.f32.mrf.mxu0 }
 0x185   :  { %v1498_v44 = vadd.f32 %v1497_v8, %v1457_v40  ;;  %v4853_v8 = vld [vmem:[%s6801_s8 + $0x118] ss:$28 sps:$4 sm:$0xff]   ;;  %v4862_v40 = vld [vmem:[%s6801_s8 + $0x460] ss:$28 sps:$4 sm:$0xff]  }
 0x186   :  { %v1499_v38 = vpop.f32.mrf.mxu0 }
 0x187   :  { %v4861_v38 = vld [vmem:[%s6801_s8 + $0xe4] ss:$28 sps:$4 sm:$0xff]  }
 0x188   :  { %v1500_v36 = vpop.f32.mrf.mxu0 }
 0x189   :  { %v4859_v36 = vld [vmem:[%s6801_s8 + $0xe0] ss:$28 sps:$4 sm:$0xff]  }
 0x18a   :  { %v1577_v43 = vpop.f32.mrf.mxu0 }
 0x18b   :  { %v1536_v42 = vpop.f32.mrf.mxu1 }
 0x18c   :  { %v1537_v45 = vadd.f32 %v1536_v42, %v1496_v41  ;;  %v1579_v47 = vpop.f32.mrf.mxu0  ;;  %v4867_v41 = vld [vmem:[%s6801_s8 + $0xac] ss:$28 sps:$4 sm:$0xff]  }
 0x18d   :  { %v1538_v46 = vpop.f32.mrf.mxu1  ;;  %v4870_v42 = vld [vmem:[%s6801_s8 + $0x42c] ss:$28 sps:$4 sm:$0xff]  }
 0x18e   :  { %v1578_v48 = vadd.f32 %v1577_v43, %v1537_v45  ;;  %v1539_v49 = vadd.f32 %v1538_v46, %v1498_v44  ;;  %v1581_v51 = vpop.f32.mrf.mxu0  ;;  %v4865_v43 = vld [vmem:[%s6801_s8 + $0xa8] ss:$28 sps:$4 sm:$0xff]   ;;  %v4873_v45 = vld [vmem:[%s6801_s8 + $0x74] ss:$28 sps:$4 sm:$0xff]  }
 0x18f   :  { %v1540_v50 = vpop.f32.mrf.mxu1  ;;  %v4868_v44 = vld [vmem:[%s6801_s8 + $0x428] ss:$28 sps:$4 sm:$0xff]   ;;  %v4876_v46 = vld [vmem:[%s6801_s8 + $0x3f4] ss:$28 sps:$4 sm:$0xff]  }
 0x190   :  { %v1580_v53 = vadd.f32 %v1579_v47, %v1539_v49  ;;  %v1586_v54 = vmax.f32 %v1578_v48, 0.0  ;;  %v1582_v56 = vpop.f32.mrf.mxu0  ;;  %v4871_v47 = vld [vmem:[%s6801_s8 + $0x70] ss:$28 sps:$4 sm:$0xff]   ;;  %v4879_v49 = vld [vmem:[%s6801_s8 + $0x3c] ss:$28 sps:$4 sm:$0xff]  }
 0x191   :  { %v1541_v55 = vpop.f32.mrf.mxu1  ;;  %v4874_v48 = vld [vmem:[%s6801_s8 + $0x3f0] ss:$28 sps:$4 sm:$0xff]   ;;  %v4882_v50 = vld [vmem:[%s6801_s8 + $0x3bc] ss:$28 sps:$4 sm:$0xff]  }
 0x192   :  { %v1587_v57 = vmax.f32 %v1580_v53, 0.0  ;;  %v1590_v59 = vpack.c.bf16 %v1586_v54, %v1586_v54  ;;  %v4877_v51 = vld [vmem:[%s6801_s8 + $0x38] ss:$28 sps:$4 sm:$0xff]   ;;  %v4885_v54 = vld [vmem:[%s6801_s8 + $0x4] ss:$28 sps:$4 sm:$0xff]  }
 0x193   :  { %v4880_v53 = vld [vmem:[%s6801_s8 + $0x3b8] ss:$28 sps:$4 sm:$0xff]   ;;  %v4888_v55 = vld [vmem:[%s6801_s8 + $0x384] ss:$28 sps:$4 sm:$0xff]  }
 0x194   :  { %v1591_v58 = vpack.c.bf16 %v1587_v57, %v1587_v57  ;;  %v4883_v56 = vld [vmem:[%s6801_s8] ss:$28 sps:$4 sm:$0xff]  }
 0x195   :  { %v4886_v57 = vld [vmem:[%s6801_s8 + $0x380] ss:$28 sps:$4 sm:$0xff]  }
 0x196   :  { %1927 = vmatprep.mubr.bf16.mxu1 %v1591_v58  ;;  %v4891_v58 = vld [vmem:[%s6801_s8 + $0x34c] ss:$28 sps:$4 sm:$0xff]  }
 0x197   :  { %1928 = vmatmul.mubr.bf16.vlgmr.msra.gmra.mxu1 %v1590_v59  ;;  %v4894_v59 = vld [vmem:[%s6801_s8 + $0x6cc] ss:$28 sps:$4 sm:$0xff]  }
 0x198   :  { %2068 = vmatprep.mubr.bf16.mxu1 %v5221_v16  ;;  %2051 = vmatpush1.bf16.msra.mxu1 %v4838_v21  ;;  %v4921_v21 = vld [vmem:[%s6801_s8 + $0x234] ss:$28 sps:$4 sm:$0xff]  }
 0x199   :  { %3571 = vmatprep.subr.bf16.mxu1 %v4846_v23  ;;  %v4919_v23 = vld [vmem:[%s6801_s8 + $0x230] ss:$28 sps:$4 sm:$0xff]  }
 0x20e   :  { %v4433_v62 = vpop.f32.mrf.mxu0 }
 0x210   :  { %v4434_v63 = vpop.f32.mrf.mxu0 }
 0x211   :  { %v4435_v0 = vadd.f32 %v4434_v63, %v4433_v62  ;;  %v4897_v62 = vld [vmem:[%s6801_s8 + $0x314] ss:$28 sps:$4 sm:$0xff]  }
 0x212   :  { %v4436_v1 = vpop.f32.mrf.mxu0  ;;  %v4900_v63 = vld [vmem:[%s6801_s8 + $0x694] ss:$28 sps:$4 sm:$0xff]  }
 0x213   :  { %v1890_v7 = vadd.f32 %v4435_v0, %v4146_v3  ;;  %v4895_v0 = vld [vmem:[%s6801_s8 + $0x310] ss:$28 sps:$4 sm:$0xff]   ;;  %v4906_v3 = vld [vmem:[%s6801_s8 + $0x65c] ss:$28 sps:$4 sm:$0xff]  }
 0x214   :  { %v4437_v2 = vpop.f32.mrf.mxu0  ;;  %v4898_v1 = vld [vmem:[%s6801_s8 + $0x690] ss:$28 sps:$4 sm:$0xff]  }
 0x215   :  { %v4903_v2 = vld [vmem:[%s6801_s8 + $0x2dc] ss:$28 sps:$4 sm:$0xff]  }
 0x257   :  { %v4455_v16 = vpop.f32.mrf.mxu1 }
 0x259   :  { %v4456_v4 = vpop.f32.mrf.mxu1 }
 0x25a   :  { %v4457_v11 = vadd.f32 %v4456_v4, %v4455_v16  ;;  %v4901_v16 = vld [vmem:[%s6801_s8 + $0x2d8] ss:$28 sps:$4 sm:$0xff]  }
 0x25b   :  { %v4458_v12 = vpop.f32.mrf.mxu1  ;;  %v4904_v4 = vld [vmem:[%s6801_s8 + $0x658] ss:$28 sps:$4 sm:$0xff]  }
 0x25c   :  { %v1930_v13 = vadd.f32 %v4457_v11, %v1890_v7  ;;  %v4909_v7 = vld [vmem:[%s6801_s8 + $0x2a4] ss:$28 sps:$4 sm:$0xff]  }
 0x25d   :  { %v4459_v14 = vpop.f32.mrf.mxu1  ;;  %v4912_v11 = vld [vmem:[%s6801_s8 + $0x624] ss:$28 sps:$4 sm:$0xff]  }
 0x25e   :  { %v1936_v15 = vmul.f32 0.5, %v1930_v13  ;;  %3919 = vst.msk [vmem:[#allocation4] sm:$0xff] %vm3918_vm1, %v1930_v13  ;;  %v4907_v12 = vld [vmem:[%s6801_s8 + $0x2a0] ss:$28 sps:$4 sm:$0xff]   ;;  %v4915_v14 = vld [vmem:[%s6801_s8 + $0x26c] ss:$28 sps:$4 sm:$0xff]  }
 0x260   :  { %v1937_v17 = vmul.f32 1.442695, %v1936_v15  ;;  %v4918_v15 = vld [vmem:[%s6801_s8 + $0x5ec] ss:$28 sps:$4 sm:$0xff]  }
 0x262   :  { %5161 = vpow2.f32 %v1937_v17  ;;  %v4913_v17 = vld [vmem:[%s6801_s8 + $0x268] ss:$28 sps:$4 sm:$0xff]  }
 0x26f   :  { %v5162_v24 = vpop.eup %5161 }
 0x270   :  { %1940 = vrot.lane.b32.xlu0 %v5162_v24, %s5222_s29  ;;  %v4922_v24 = vld [vmem:[%s6801_s8 + $0x5b0] ss:$28 sps:$4 sm:$0xff]  }
 0x2e2   :  { %v1941_v26 = vpop.permute.xlu0 %1940 }
 0x2e3   :  { %v1943_v27 = vmul.f32 %v1941_v26, %v1935_v25  ;;  %v4927_v25 = vld [vmem:[%s6801_s8 + $0x1fc] ss:$28 sps:$4 sm:$0xff]  }
 0x2e4   :  { %v4930_v26 = vld [vmem:[%s6801_s8 + $0x57c] ss:$28 sps:$4 sm:$0xff]  }
 0x2e5   :  { %v1944_v28 = vadd.f32 %v1943_v27, %v1930_v13  ;;  %v4910_v13 = vld [vmem:[%s6801_s8 + $0x620] ss:$28 sps:$4 sm:$0xff]   ;;  %v4925_v27 = vld [vmem:[%s6801_s8 + $0x1f8] ss:$28 sps:$4 sm:$0xff]  }
 0x2e7   :  { %v1945_v9 = vpack.c.bf16 %v1944_v28, %v1944_v28  ;;  %v4928_v28 = vld [vmem:[%s6801_s8 + $0x578] ss:$28 sps:$4 sm:$0xff]  }
 0x2e9   :  { %4183 = vmatmul.mubr.msk.bf16.vlgmr.msra.gmra.mxu0 %vm1252_vm0, %v1945_v9  ;;  %4184 = vmatmul.mubr.msk.bf16.vlgmr.msra.gmra.mxu1 %vm1252_vm0, %v1945_v9  ;;  %v4931_v9 = vld [vmem:[%s6801_s8 + $0x1c0] ss:$28 sps:$4 sm:$0xff]  }
 0x2ea   :  { %3531 = vmatpush1.bf16.msra.mxu0 %v4841_v29  ;;  %3572 = vmatpush1.bf16.msra.mxu1 %v4844_v30  ;;  %v4933_v29 = vld [vmem:[%s6801_s8 + $0x1c4] ss:$28 sps:$4 sm:$0xff]  }
 0x2eb   :  { %3532 = vmatprep.subr.bf16.mxu0 %v4849_v31  ;;  %3573 = vmatprep.subr.bf16.mxu1 %v4852_v32  ;;  %v4936_v30 = vld [vmem:[%s6801_s8 + $0x544] ss:$28 sps:$4 sm:$0xff]   ;;  %v4939_v32 = vld [vmem:[%s6801_s8 + $0x194] ss:$28 sps:$4 sm:$0xff]  }
 0x2ec   :  { %v4934_v31 = vld [vmem:[%s6801_s8 + $0x540] ss:$28 sps:$4 sm:$0xff]  }
 0x2ee   :  { %3533 = vmatpush1.bf16.msra.mxu0 %v4847_v52  ;;  %3574 = vmatpush1.bf16.msra.mxu1 %v4850_v19  ;;  %v4942_v52 = vld [vmem:[%s6801_s8 + $0x514] ss:$28 sps:$4 sm:$0xff]   ;;  %v1950_v19 = vld [vmem:[%s6800_s7] sm:$0xf] }
 0x2ef   :  { %3534 = vmatprep.subr.bf16.mxu0 %v4855_v34  ;;  %3575 = vmatprep.subr.bf16.mxu1 %v4858_v35  ;;  %v1955_v34 = vrot.slane %v1950_v19, %v6025_v6  ;;  %v1963_v35 = vrot.slane %v1950_v19, %v6037_v20 }
 0x2f2   :  { %3535 = vmatpush1.bf16.msra.mxu0 %v4853_v8  ;;  %3576 = vmatpush1.bf16.msra.mxu1 %v4856_v37  ;;  %v1959_v8 = vrot.slane %v1950_v19, %v6031_v10  ;;  %v1967_v37 = vrot.slane %v1950_v19, %v6040_v33  ;;  %v4993_v19 = vld [vmem:[%s6801_s8 + $0x31c] ss:$28 sps:$4 sm:$0xff]  }
 0x2f3   :  { %3536 = vmatprep.subr.bf16.mxu0 %v4861_v38  ;;  %3577 = vmatprep.subr.bf16.mxu1 %v4864_v39 }
 0x2f6   :  { %3537 = vmatpush1.bf16.msra.mxu0 %v4859_v36  ;;  %3578 = vmatpush1.bf16.msra.mxu1 %v4862_v40 }
 0x2f7   :  { %3538 = vmatprep.subr.bf16.mxu0 %v4867_v41  ;;  %3579 = vmatprep.subr.bf16.mxu1 %v4870_v42 }
 0x2fa   :  { %3539 = vmatpush1.bf16.msra.mxu0 %v4865_v43  ;;  %3580 = vmatpush1.bf16.msra.mxu1 %v4868_v44 }
 0x2fb   :  { %3540 = vmatprep.subr.bf16.mxu0 %v4873_v45  ;;  %3581 = vmatprep.subr.bf16.mxu1 %v4876_v46 }
 0x2fe   :  { %3541 = vmatpush1.bf16.msra.mxu0 %v4871_v47  ;;  %3582 = vmatpush1.bf16.msra.mxu1 %v4874_v48 }
 0x2ff   :  { %3542 = vmatprep.subr.bf16.mxu0 %v4879_v49  ;;  %3583 = vmatprep.subr.bf16.mxu1 %v4882_v50 }
 0x302   :  { %3543 = vmatpush1.bf16.msra.mxu0 %v4877_v51  ;;  %3584 = vmatpush1.bf16.msra.mxu1 %v4880_v53 }
 0x303   :  { %3544 = vmatprep.subr.bf16.mxu0 %v4885_v54  ;;  %3585 = vmatprep.subr.bf16.mxu1 %v4888_v55 }
 0x306   :  { %3545 = vmatpush1.bf16.msra.mxu0 %v4883_v56  ;;  %3586 = vmatpush1.bf16.msra.mxu1 %v4886_v57  ;;  %v4937_v56 = vld [vmem:[%s6801_s8 + $0x190] ss:$28 sps:$4 sm:$0xff]  }
 0x307   :  { %3546 = vmatprep.subr.bf16.mxu0 %v4891_v58  ;;  %3587 = vmatprep.subr.bf16.mxu1 %v4894_v59  ;;  %v4940_v57 = vld [vmem:[%s6801_s8 + $0x510] ss:$28 sps:$4 sm:$0xff]  }
 0x30a   :  { %3547 = vmatpush2.bf16.msra.mxu0 %v4889_v60  ;;  %3588 = vmatpush2.bf16.msra.mxu1 %v4892_v61  ;;  %v4945_v60 = vld [vmem:[%s6801_s8 + $0x15c] ss:$28 sps:$4 sm:$0xff]  }
 0x30b   :  { %3548 = vmatprep.subr.bf16.mxu0 %v4897_v62  ;;  %3589 = vmatprep.subr.bf16.mxu1 %v4900_v63  ;;  %v4948_v61 = vld [vmem:[%s6801_s8 + $0x4dc] ss:$28 sps:$4 sm:$0xff]  }
 0x30c   :  { %v4943_v62 = vld [vmem:[%s6801_s8 + $0x158] ss:$28 sps:$4 sm:$0xff]  }
 0x30d   :  { %v4946_v63 = vld [vmem:[%s6801_s8 + $0x4d8] ss:$28 sps:$4 sm:$0xff]  }
 0x30e   :  { %3549 = vmatpush2.bf16.msra.mxu0 %v4895_v0  ;;  %3590 = vmatpush2.bf16.msra.mxu1 %v4898_v1  ;;  %v4951_v0 = vld [vmem:[%s6801_s8 + $0x124] ss:$28 sps:$4 sm:$0xff]  }
 0x30f   :  { %3550 = vmatprep.subr.bf16.mxu0 %v4903_v2  ;;  %3591 = vmatprep.subr.bf16.mxu1 %v4906_v3  ;;  %v4954_v1 = vld [vmem:[%s6801_s8 + $0x4a4] ss:$28 sps:$4 sm:$0xff]  }
 0x310   :  { %v4949_v2 = vld [vmem:[%s6801_s8 + $0x120] ss:$28 sps:$4 sm:$0xff]  }
 0x311   :  { %v4952_v3 = vld [vmem:[%s6801_s8 + $0x4a0] ss:$28 sps:$4 sm:$0xff]  }
 0x312   :  { %3551 = vmatpush2.bf16.msra.mxu0 %v4901_v16  ;;  %3592 = vmatpush2.bf16.msra.mxu1 %v4904_v4  ;;  %v4957_v16 = vld [vmem:[%s6801_s8 + $0xec] ss:$28 sps:$4 sm:$0xff]  }
 0x313   :  { %3552 = vmatprep.subr.bf16.mxu0 %v4909_v7  ;;  %3593 = vmatprep.subr.bf16.mxu1 %v4912_v11  ;;  %v4960_v4 = vld [vmem:[%s6801_s8 + $0x46c] ss:$28 sps:$4 sm:$0xff]  }
 0x314   :  { %v4955_v7 = vld [vmem:[%s6801_s8 + $0xe8] ss:$28 sps:$4 sm:$0xff]  }
 0x315   :  { %v4958_v11 = vld [vmem:[%s6801_s8 + $0x468] ss:$28 sps:$4 sm:$0xff]  }
 0x316   :  { %3553 = vmatpush2.bf16.msra.mxu0 %v4907_v12  ;;  %3594 = vmatpush2.bf16.msra.mxu1 %v4910_v13  ;;  %v4963_v12 = vld [vmem:[%s6801_s8 + $0xb4] ss:$28 sps:$4 sm:$0xff]  }
 0x317   :  { %3554 = vmatprep.subr.bf16.mxu0 %v4915_v14  ;;  %3595 = vmatprep.subr.bf16.mxu1 %v4918_v15  ;;  %v4966_v13 = vld [vmem:[%s6801_s8 + $0x434] ss:$28 sps:$4 sm:$0xff]  }
 0x318   :  { %v4961_v14 = vld [vmem:[%s6801_s8 + $0xb0] ss:$28 sps:$4 sm:$0xff]  }
 0x319   :  { %v4964_v15 = vld [vmem:[%s6801_s8 + $0x430] ss:$28 sps:$4 sm:$0xff]  }
 0x31a   :  { %3555 = vmatpush2.bf16.msra.mxu0 %v4913_v17  ;;  %3596 = vmatpush2.bf16.msra.mxu1 %v4916_v18  ;;  %v4969_v17 = vld [vmem:[%s6801_s8 + $0x7c] ss:$28 sps:$4 sm:$0xff]  }
 0x31b   :  { %3556 = vmatprep.subr.bf16.mxu0 %v4921_v21  ;;  %3597 = vmatprep.subr.bf16.mxu1 %v4924_v22  ;;  %v4972_v18 = vld [vmem:[%s6801_s8 + $0x3fc] ss:$28 sps:$4 sm:$0xff]  }
 0x31c   :  { %v4967_v21 = vld [vmem:[%s6801_s8 + $0x78] ss:$28 sps:$4 sm:$0xff]  }
 0x31d   :  { %v4970_v22 = vld [vmem:[%s6801_s8 + $0x3f8] ss:$28 sps:$4 sm:$0xff]  }
 0x31e   :  { %3557 = vmatpush2.bf16.msra.mxu0 %v4919_v23  ;;  %3598 = vmatpush2.bf16.msra.mxu1 %v4922_v24  ;;  %v4975_v23 = vld [vmem:[%s6801_s8 + $0x44] ss:$28 sps:$4 sm:$0xff]  }
 0x31f   :  { %3558 = vmatprep.subr.bf16.mxu0 %v4927_v25  ;;  %3599 = vmatprep.subr.bf16.mxu1 %v4930_v26  ;;  %v4978_v24 = vld [vmem:[%s6801_s8 + $0x3c4] ss:$28 sps:$4 sm:$0xff]  }
 0x320   :  { %v4973_v25 = vld [vmem:[%s6801_s8 + $0x40] ss:$28 sps:$4 sm:$0xff]  }
 0x321   :  { %v4976_v26 = vld [vmem:[%s6801_s8 + $0x3c0] ss:$28 sps:$4 sm:$0xff]  }
 0x322   :  { %3559 = vmatpush2.bf16.msra.mxu0 %v4925_v27  ;;  %3600 = vmatpush2.bf16.msra.mxu1 %v4928_v28  ;;  %v4981_v27 = vld [vmem:[%s6801_s8 + $0xc] ss:$28 sps:$4 sm:$0xff]  }
 0x323   :  { %3560 = vmatprep.subr.bf16.mxu0 %v4933_v29  ;;  %3601 = vmatprep.subr.bf16.mxu1 %v4936_v30  ;;  %v4984_v28 = vld [vmem:[%s6801_s8 + $0x38c] ss:$28 sps:$4 sm:$0xff]  }
 0x324   :  { %v4979_v29 = vld [vmem:[%s6801_s8 + $0x8] ss:$28 sps:$4 sm:$0xff]  }
 0x325   :  { %v4982_v30 = vld [vmem:[%s6801_s8 + $0x388] ss:$28 sps:$4 sm:$0xff]  }
 0x326   :  { %3561 = vmatpush2.bf16.msra.mxu0 %v4931_v9  ;;  %3602 = vmatpush2.bf16.msra.mxu1 %v4934_v31  ;;  %v4987_v9 = vld [vmem:[%s6801_s8 + $0x354] ss:$28 sps:$4 sm:$0xff]  }
 0x327   :  { %3612 = vmatprep.subr.bf16.mxu0 %v4939_v32  ;;  %3653 = vmatprep.subr.bf16.mxu1 %v4942_v52  ;;  %v4990_v31 = vld [vmem:[%s6801_s8 + $0x6d4] ss:$28 sps:$4 sm:$0xff]  }
 0x328   :  { %v4985_v32 = vld [vmem:[%s6801_s8 + $0x350] ss:$28 sps:$4 sm:$0xff]  }
 0x329   :  { %v4988_v52 = vld [vmem:[%s6801_s8 + $0x6d0] ss:$28 sps:$4 sm:$0xff]  }
 0x3a9   :  { %v2029_v38 = vpop.f32.mrf.mxu0  ;;  %v2070_v39 = vpop.f32.mrf.mxu1 }
 0x3aa   :  { %v2030_v36 = vadd.f32 %v2029_v38, %v1955_v34  ;;  %v2071_v40 = vadd.f32 %v2070_v39, %v1963_v35  ;;  %v4996_v34 = vld [vmem:[%s6801_s8 + $0x69c] ss:$28 sps:$4 sm:$0xff]   ;;  %v5002_v38 = vld [vmem:[%s6801_s8 + $0x664] ss:$28 sps:$4 sm:$0xff]  }
 0x3ab   :  { %v2031_v41 = vpop.f32.mrf.mxu0  ;;  %v2072_v42 = vpop.f32.mrf.mxu1  ;;  %v4991_v35 = vld [vmem:[%s6801_s8 + $0x318] ss:$28 sps:$4 sm:$0xff]   ;;  %v4997_v39 = vld [vmem:[%s6801_s8 + $0x2e0] ss:$28 sps:$4 sm:$0xff]  }
 0x3ac   :  { %v2032_v43 = vadd.f32 %v2031_v41, %v1959_v8  ;;  %v2073_v44 = vadd.f32 %v2072_v42, %v1967_v37  ;;  %v2077_v45 = vmax.f32 %v2030_v36, 0.0  ;;  %v2079_v46 = vmax.f32 %v2071_v40, 0.0  ;;  %v4994_v8 = vld [vmem:[%s6801_s8 + $0x698] ss:$28 sps:$4 sm:$0xff]   ;;  %v4999_v37 = vld [vmem:[%s6801_s8 + $0x2e4] ss:$28 sps:$4 sm:$0xff]  }
 0x3ad   :  { %v2033_v47 = vpop.f32.mrf.mxu0  ;;  %v2074_v48 = vpop.f32.mrf.mxu1  ;;  %v5000_v36 = vld [vmem:[%s6801_s8 + $0x660] ss:$28 sps:$4 sm:$0xff]   ;;  %v5005_v40 = vld [vmem:[%s6801_s8 + $0x2ac] ss:$28 sps:$4 sm:$0xff]  }
 0x3ae   :  { %v2078_v49 = vmax.f32 %v2032_v43, 0.0  ;;  %v2080_v50 = vmax.f32 %v2073_v44, 0.0  ;;  %v6280_v58 = vpack.c.bf16 %v2077_v45, %v2077_v45  ;;  %v6282_v59 = vpack.c.bf16 %v2079_v46, %v2079_v46  ;;  %v5008_v41 = vld [vmem:[%s6801_s8 + $0x62c] ss:$28 sps:$4 sm:$0xff]   ;;  %v5011_v44 = vld [vmem:[%s6801_s8 + $0x274] ss:$28 sps:$4 sm:$0xff]  }
 0x3af   :  { %v2034_v51 = vpop.f32.mrf.mxu0  ;;  %v2075_v53 = vpop.f32.mrf.mxu1  ;;  %v5003_v42 = vld [vmem:[%s6801_s8 + $0x2a8] ss:$28 sps:$4 sm:$0xff]   ;;  %v5014_v45 = vld [vmem:[%s6801_s8 + $0x5f4] ss:$28 sps:$4 sm:$0xff]   ;;  %v5017_v48 = vld [vmem:[%s6801_s8 + $0x23c] ss:$28 sps:$4 sm:$0xff]  }
 0x3b0   :  { %v6270_v54 = vpack.c.bf16 %v2078_v49, %v2078_v49  ;;  %v6272_v55 = vpack.c.bf16 %v2080_v50, %v2080_v50  ;;  %v5006_v43 = vld [vmem:[%s6801_s8 + $0x628] ss:$28 sps:$4 sm:$0xff]   ;;  %v5009_v46 = vld [vmem:[%s6801_s8 + $0x270] ss:$28 sps:$4 sm:$0xff]   ;;  %v5020_v49 = vld [vmem:[%s6801_s8 + $0x5bc] ss:$28 sps:$4 sm:$0xff]  }
 0x3b1   :  { %v5012_v47 = vld [vmem:[%s6801_s8 + $0x5f0] ss:$28 sps:$4 sm:$0xff]   ;;  %v5015_v50 = vld [vmem:[%s6801_s8 + $0x238] ss:$28 sps:$4 sm:$0xff]   ;;  %v5023_v53 = vld [vmem:[%s6801_s8 + $0x204] ss:$28 sps:$4 sm:$0xff]  }
 0x3b2   :  { %3562 = vmatprep.mubr.bf16.mxu0 %v6270_v54  ;;  %3603 = vmatprep.mubr.bf16.mxu1 %v6272_v55  ;;  %v5018_v51 = vld [vmem:[%s6801_s8 + $0x5b8] ss:$28 sps:$4 sm:$0xff]  }
 0x3b3   :  { %3563 = vmatmul.mubr.bf16.vlgmr.msra.gmra.mxu0 %v6280_v58  ;;  %3604 = vmatmul.mubr.bf16.vlgmr.msra.gmra.mxu1 %v6282_v59 }
 0x3b4   :  { %3613 = vmatpush1.bf16.msra.mxu0 %v4937_v56  ;;  %3654 = vmatpush1.bf16.msra.mxu1 %v4940_v57  ;;  %v5026_v56 = vld [vmem:[%s6801_s8 + $0x584] ss:$28 sps:$4 sm:$0xff]  }
 0x3b5   :  { %3644 = vmatprep.mubr.bf16.mxu0 %v6270_v54  ;;  %3685 = vmatprep.mubr.bf16.mxu1 %v6272_v55  ;;  %v5021_v57 = vld [vmem:[%s6801_s8 + $0x200] ss:$28 sps:$4 sm:$0xff]  }
 0x3b6   :  { %3614 = vmatprep.subr.bf16.mxu0 %v4945_v60  ;;  %3655 = vmatprep.subr.bf16.mxu1 %v4948_v61  ;;  %v5024_v60 = vld [vmem:[%s6801_s8 + $0x580] ss:$28 sps:$4 sm:$0xff]   ;;  %v5029_v61 = vld [vmem:[%s6801_s8 + $0x1cc] ss:$28 sps:$4 sm:$0xff]  }
 0x3b8   :  { %3615 = vmatpush1.bf16.msra.mxu0 %v4943_v62  ;;  %3656 = vmatpush1.bf16.msra.mxu1 %v4946_v63  ;;  %v5032_v62 = vld [vmem:[%s6801_s8 + $0x54c] ss:$28 sps:$4 sm:$0xff]  }
 0x3b9   :  { %3616 = vmatprep.subr.bf16.mxu0 %v4951_v0  ;;  %3657 = vmatprep.subr.bf16.mxu1 %v4954_v1  ;;  %v5027_v63 = vld [vmem:[%s6801_s8 + $0x1c8] ss:$28 sps:$4 sm:$0xff]   ;;  %v5035_v1 = vld [vmem:[%s6801_s8 + $0x19c] ss:$28 sps:$4 sm:$0xff]  }
 0x3ba   :  { %v5030_v0 = vld [vmem:[%s6801_s8 + $0x548] ss:$28 sps:$4 sm:$0xff]  }
 0x3bc   :  { %3617 = vmatpush1.bf16.msra.mxu0 %v4949_v2  ;;  %3658 = vmatpush1.bf16.msra.mxu1 %v4952_v3  ;;  %v5038_v2 = vld [vmem:[%s6801_s8 + $0x51c] ss:$28 sps:$4 sm:$0xff]  }
 0x3bd   :  { %3618 = vmatprep.subr.bf16.mxu0 %v4957_v16  ;;  %3659 = vmatprep.subr.bf16.mxu1 %v4960_v4  ;;  %v5033_v3 = vld [vmem:[%s6801_s8 + $0x198] ss:$28 sps:$4 sm:$0xff]   ;;  %v5041_v4 = vld [vmem:[%s6801_s8 + $0x164] ss:$28 sps:$4 sm:$0xff]  }
 0x3be   :  { %v5036_v16 = vld [vmem:[%s6801_s8 + $0x518] ss:$28 sps:$4 sm:$0xff]  }
 0x3c0   :  { %3619 = vmatpush1.bf16.msra.mxu0 %v4955_v7  ;;  %3660 = vmatpush1.bf16.msra.mxu1 %v4958_v11  ;;  %v5044_v7 = vld [vmem:[%s6801_s8 + $0x4e4] ss:$28 sps:$4 sm:$0xff]  }
 0x3c1   :  { %3620 = vmatprep.subr.bf16.mxu0 %v4963_v12  ;;  %3661 = vmatprep.subr.bf16.mxu1 %v4966_v13  ;;  %v5039_v11 = vld [vmem:[%s6801_s8 + $0x160] ss:$28 sps:$4 sm:$0xff]   ;;  %v5047_v13 = vld [vmem:[%s6801_s8 + $0x12c] ss:$28 sps:$4 sm:$0xff]  }
 0x3c2   :  { %v5042_v12 = vld [vmem:[%s6801_s8 + $0x4e0] ss:$28 sps:$4 sm:$0xff]  }
 0x3c4   :  { %3621 = vmatpush1.bf16.msra.mxu0 %v4961_v14  ;;  %3662 = vmatpush1.bf16.msra.mxu1 %v4964_v15  ;;  %v5050_v14 = vld [vmem:[%s6801_s8 + $0x4ac] ss:$28 sps:$4 sm:$0xff]  }
 0x3c5   :  { %3622 = vmatprep.subr.bf16.mxu0 %v4969_v17  ;;  %3663 = vmatprep.subr.bf16.mxu1 %v4972_v18  ;;  %v5045_v15 = vld [vmem:[%s6801_s8 + $0x128] ss:$28 sps:$4 sm:$0xff]   ;;  %v5053_v18 = vld [vmem:[%s6801_s8 + $0xf4] ss:$28 sps:$4 sm:$0xff]  }
 0x3c6   :  { %v5048_v17 = vld [vmem:[%s6801_s8 + $0x4a8] ss:$28 sps:$4 sm:$0xff]  }
 0x3c8   :  { %3623 = vmatpush1.bf16.msra.mxu0 %v4967_v21  ;;  %3664 = vmatpush1.bf16.msra.mxu1 %v4970_v22  ;;  %v5056_v21 = vld [vmem:[%s6801_s8 + $0x474] ss:$28 sps:$4 sm:$0xff]  }
 0x3c9   :  { %3624 = vmatprep.subr.bf16.mxu0 %v4975_v23  ;;  %3665 = vmatprep.subr.bf16.mxu1 %v4978_v24  ;;  %v5051_v22 = vld [vmem:[%s6801_s8 + $0xf0] ss:$28 sps:$4 sm:$0xff]   ;;  %v5059_v24 = vld [vmem:[%s6801_s8 + $0xbc] ss:$28 sps:$4 sm:$0xff]  }
 0x3ca   :  { %v5054_v23 = vld [vmem:[%s6801_s8 + $0x470] ss:$28 sps:$4 sm:$0xff]  }
 0x3cc   :  { %3625 = vmatpush1.bf16.msra.mxu0 %v4973_v25  ;;  %3666 = vmatpush1.bf16.msra.mxu1 %v4976_v26  ;;  %v5062_v25 = vld [vmem:[%s6801_s8 + $0x43c] ss:$28 sps:$4 sm:$0xff]  }
 0x3cd   :  { %3626 = vmatprep.subr.bf16.mxu0 %v4981_v27  ;;  %3667 = vmatprep.subr.bf16.mxu1 %v4984_v28  ;;  %v5057_v26 = vld [vmem:[%s6801_s8 + $0xb8] ss:$28 sps:$4 sm:$0xff]   ;;  %v5065_v28 = vld [vmem:[%s6801_s8 + $0x84] ss:$28 sps:$4 sm:$0xff]  }
 0x3ce   :  { %v5060_v27 = vld [vmem:[%s6801_s8 + $0x438] ss:$28 sps:$4 sm:$0xff]  }
 0x3d0   :  { %3627 = vmatpush1.bf16.msra.mxu0 %v4979_v29  ;;  %3668 = vmatpush1.bf16.msra.mxu1 %v4982_v30  ;;  %v5068_v29 = vld [vmem:[%s6801_s8 + $0x404] ss:$28 sps:$4 sm:$0xff]  }
 0x3d1   :  { %3628 = vmatprep.subr.bf16.mxu0 %v4987_v9  ;;  %3669 = vmatprep.subr.bf16.mxu1 %v4990_v31  ;;  %v5063_v30 = vld [vmem:[%s6801_s8 + $0x80] ss:$28 sps:$4 sm:$0xff]   ;;  %v5071_v31 = vld [vmem:[%s6801_s8 + $0x4c] ss:$28 sps:$4 sm:$0xff]  }
 0x3d2   :  { %v5066_v9 = vld [vmem:[%s6801_s8 + $0x400] ss:$28 sps:$4 sm:$0xff]  }
 0x3d4   :  { %3629 = vmatpush2.bf16.msra.mxu0 %v4985_v32  ;;  %3670 = vmatpush2.bf16.msra.mxu1 %v4988_v52  ;;  %v5074_v32 = vld [vmem:[%s6801_s8 + $0x3cc] ss:$28 sps:$4 sm:$0xff]  }
 0x3d5   :  { %3630 = vmatprep.subr.bf16.mxu0 %v4993_v19  ;;  %3671 = vmatprep.subr.bf16.mxu1 %v4996_v34  ;;  %v5069_v52 = vld [vmem:[%s6801_s8 + $0x48] ss:$28 sps:$4 sm:$0xff]   ;;  %v5077_v34 = vld [vmem:[%s6801_s8 + $0x14] ss:$28 sps:$4 sm:$0xff]  }
 0x3d6   :  { %v5072_v19 = vld [vmem:[%s6801_s8 + $0x3c8] ss:$28 sps:$4 sm:$0xff]  }
 0x3d8   :  { %3631 = vmatpush2.bf16.msra.mxu0 %v4991_v35  ;;  %3672 = vmatpush2.bf16.msra.mxu1 %v4994_v8  ;;  %v5080_v35 = vld [vmem:[%s6801_s8 + $0x394] ss:$28 sps:$4 sm:$0xff]  }
 0x3d9   :  { %3632 = vmatprep.subr.bf16.mxu0 %v4999_v37  ;;  %3673 = vmatprep.subr.bf16.mxu1 %v5002_v38  ;;  %v5075_v8 = vld [vmem:[%s6801_s8 + $0x10] ss:$28 sps:$4 sm:$0xff]   ;;  %v5083_v38 = vld [vmem:[%s6801_s8 + $0x35c] ss:$28 sps:$4 sm:$0xff]  }
 0x3da   :  { %v5078_v37 = vld [vmem:[%s6801_s8 + $0x390] ss:$28 sps:$4 sm:$0xff]  }
 0x3dc   :  { %3633 = vmatpush2.bf16.msra.mxu0 %v4997_v39  ;;  %3674 = vmatpush2.bf16.msra.mxu1 %v5000_v36  ;;  %v5086_v39 = vld [vmem:[%s6801_s8 + $0x6dc] ss:$28 sps:$4 sm:$0xff]  }
 0x3dd   :  { %3634 = vmatprep.subr.bf16.mxu0 %v5005_v40  ;;  %3675 = vmatprep.subr.bf16.mxu1 %v5008_v41  ;;  %v5081_v36 = vld [vmem:[%s6801_s8 + $0x358] ss:$28 sps:$4 sm:$0xff]   ;;  %v5089_v41 = vld [vmem:[%s6801_s8 + $0x324] ss:$28 sps:$4 sm:$0xff]  }
 0x3de   :  { %v5084_v40 = vld [vmem:[%s6801_s8 + $0x6d8] ss:$28 sps:$4 sm:$0xff]  }
 0x3e0   :  { %3635 = vmatpush2.bf16.msra.mxu0 %v5003_v42  ;;  %3676 = vmatpush2.bf16.msra.mxu1 %v5006_v43  ;;  %v5092_v42 = vld [vmem:[%s6801_s8 + $0x6a4] ss:$28 sps:$4 sm:$0xff]  }
 0x3e1   :  { %3636 = vmatprep.subr.bf16.mxu0 %v5011_v44  ;;  %3677 = vmatprep.subr.bf16.mxu1 %v5014_v45  ;;  %v5087_v43 = vld [vmem:[%s6801_s8 + $0x320] ss:$28 sps:$4 sm:$0xff]   ;;  %v5095_v45 = vld [vmem:[%s6801_s8 + $0x2ec] ss:$28 sps:$4 sm:$0xff]  }
 0x3e2   :  { %v5090_v44 = vld [vmem:[%s6801_s8 + $0x6a0] ss:$28 sps:$4 sm:$0xff]  }
 0x3e4   :  { %3637 = vmatpush2.bf16.msra.mxu0 %v5009_v46  ;;  %3678 = vmatpush2.bf16.msra.mxu1 %v5012_v47  ;;  %v5098_v46 = vld [vmem:[%s6801_s8 + $0x66c] ss:$28 sps:$4 sm:$0xff]  }
 0x3e5   :  { %3638 = vmatprep.subr.bf16.mxu0 %v5017_v48  ;;  %3679 = vmatprep.subr.bf16.mxu1 %v5020_v49  ;;  %v5093_v47 = vld [vmem:[%s6801_s8 + $0x2e8] ss:$28 sps:$4 sm:$0xff]   ;;  %v5101_v49 = vld [vmem:[%s6801_s8 + $0x2b4] ss:$28 sps:$4 sm:$0xff]  }
 0x3e6   :  { %v5096_v48 = vld [vmem:[%s6801_s8 + $0x668] ss:$28 sps:$4 sm:$0xff]  }
 0x3e8   :  { %3639 = vmatpush2.bf16.msra.mxu0 %v5015_v50  ;;  %3680 = vmatpush2.bf16.msra.mxu1 %v5018_v51  ;;  %v5104_v50 = vld [vmem:[%s6801_s8 + $0x634] ss:$28 sps:$4 sm:$0xff]  }
 0x3e9   :  { %3640 = vmatprep.subr.bf16.mxu0 %v5023_v53  ;;  %3681 = vmatprep.subr.bf16.mxu1 %v5026_v56  ;;  %v5099_v51 = vld [vmem:[%s6801_s8 + $0x2b0] ss:$28 sps:$4 sm:$0xff]   ;;  %v5107_v56 = vld [vmem:[%s6801_s8 + $0x27c] ss:$28 sps:$4 sm:$0xff]  }
 0x3ea   :  { %v5102_v53 = vld [vmem:[%s6801_s8 + $0x630] ss:$28 sps:$4 sm:$0xff]  }
 0x3ec   :  { %3641 = vmatpush2.bf16.msra.mxu0 %v5021_v57  ;;  %3682 = vmatpush2.bf16.msra.mxu1 %v5024_v60  ;;  %v5110_v57 = vld [vmem:[%s6801_s8 + $0x5fc] ss:$28 sps:$4 sm:$0xff]  }
 0x3ed   :  { %3642 = vmatprep.subr.bf16.mxu0 %v5029_v61  ;;  %3683 = vmatprep.subr.bf16.mxu1 %v5032_v62  ;;  %v5105_v60 = vld [vmem:[%s6801_s8 + $0x278] ss:$28 sps:$4 sm:$0xff]   ;;  %v5113_v62 = vld [vmem:[%s6801_s8 + $0x244] ss:$28 sps:$4 sm:$0xff]  }
 0x3ee   :  { %v5108_v61 = vld [vmem:[%s6801_s8 + $0x5f8] ss:$28 sps:$4 sm:$0xff]  }
 0x3f0   :  { %3643 = vmatpush2.bf16.msra.mxu0 %v5027_v63  ;;  %3684 = vmatpush2.bf16.msra.mxu1 %v5030_v0  ;;  %v5116_v63 = vld [vmem:[%s6801_s8 + $0x5c4] ss:$28 sps:$4 sm:$0xff]  }
 0x3f1   :  { %3694 = vmatprep.subr.bf16.mxu0 %v5035_v1  ;;  %3735 = vmatprep.subr.bf16.mxu1 %v5038_v2  ;;  %v5111_v0 = vld [vmem:[%s6801_s8 + $0x240] ss:$28 sps:$4 sm:$0xff]   ;;  %v5119_v2 = vld [vmem:[%s6801_s8 + $0x20c] ss:$28 sps:$4 sm:$0xff]  }
 0x3f2   :  { %v5114_v1 = vld [vmem:[%s6801_s8 + $0x5c0] ss:$28 sps:$4 sm:$0xff]  }
 0x3f3   :  { %3645 = vmatmul.mubr.bf16.vlgmr.msra.gmra.mxu0 %v6280_v58  ;;  %3686 = vmatmul.mubr.bf16.vlgmr.msra.gmra.mxu1 %v6282_v59 }
 0x3f4   :  { %3695 = vmatpush1.bf16.msra.mxu0 %v5033_v3  ;;  %3726 = vmatprep.mubr.bf16.mxu0 %v6270_v54  ;;  %v5122_v3 = vld [vmem:[%s6801_s8 + $0x58c] ss:$28 sps:$4 sm:$0xff]  }
 0x3f5   :  { %3736 = vmatpush1.bf16.msra.mxu1 %v5036_v16  ;;  %3767 = vmatprep.mubr.bf16.mxu1 %v6272_v55  ;;  %v5117_v16 = vld [vmem:[%s6801_s8 + $0x208] ss:$28 sps:$4 sm:$0xff]  }
 0x3f6   :  { %3696 = vmatprep.subr.bf16.mxu0 %v5041_v4  ;;  %3737 = vmatprep.subr.bf16.mxu1 %v5044_v7  ;;  %v5120_v4 = vld [vmem:[%s6801_s8 + $0x588] ss:$28 sps:$4 sm:$0xff]   ;;  %v5125_v7 = vld [vmem:[%s6801_s8 + $0x1d4] ss:$28 sps:$4 sm:$0xff]  }
 0x3f8   :  { %3697 = vmatpush1.bf16.msra.mxu0 %v5039_v11  ;;  %v5128_v11 = vld [vmem:[%s6801_s8 + $0x554] ss:$28 sps:$4 sm:$0xff]  }
 0x3f9   :  { %3738 = vmatpush1.bf16.msra.mxu1 %v5042_v12  ;;  %3698 = vmatprep.subr.bf16.mxu0 %v5047_v13  ;;  %v5123_v12 = vld [vmem:[%s6801_s8 + $0x1d0] ss:$28 sps:$4 sm:$0xff]  }
 0x3fa   :  { %3739 = vmatprep.subr.bf16.mxu1 %v5050_v14  ;;  %v5126_v13 = vld [vmem:[%s6801_s8 + $0x550] ss:$28 sps:$4 sm:$0xff]   ;;  %v5129_v14 = vld [vmem:[%s6801_s8 + $0x360] ss:$28 sps:$4 sm:$0xff]  }
 0x3fc   :  { %3699 = vmatpush1.bf16.msra.mxu0 %v5045_v15  ;;  %v5130_v15 = vld [vmem:[%s6801_s8 + $0x6e0] ss:$28 sps:$4 sm:$0xff]  }
 0x3fd   :  { %3740 = vmatpush1.bf16.msra.mxu1 %v5048_v17  ;;  %3700 = vmatprep.subr.bf16.mxu0 %v5053_v18  ;;  %v5131_v17 = vld [vmem:[%s6801_s8 + $0x1a0] ss:$28 sps:$4 sm:$0xff]  }
 0x3fe   :  { %3741 = vmatprep.subr.bf16.mxu1 %v5056_v21  ;;  %v5132_v18 = vld [vmem:[%s6801_s8 + $0x520] ss:$28 sps:$4 sm:$0xff]   ;;  %v5133_v21 = vld [vmem:[%s6801_s8 + $0x328] ss:$28 sps:$4 sm:$0xff]  }
 0x400   :  { %3701 = vmatpush1.bf16.msra.mxu0 %v5051_v22  ;;  %v5134_v22 = vld [vmem:[%s6801_s8 + $0x6a8] ss:$28 sps:$4 sm:$0xff]  }
 0x401   :  { %3742 = vmatpush1.bf16.msra.mxu1 %v5054_v23  ;;  %3702 = vmatprep.subr.bf16.mxu0 %v5059_v24  ;;  %v5135_v23 = vld [vmem:[%s6801_s8 + $0x168] ss:$28 sps:$4 sm:$0xff]  }
 0x402   :  { %3743 = vmatprep.subr.bf16.mxu1 %v5062_v25  ;;  %v5136_v24 = vld [vmem:[%s6801_s8 + $0x4e8] ss:$28 sps:$4 sm:$0xff]   ;;  %v5137_v25 = vld [vmem:[%s6801_s8 + $0x2f0] ss:$28 sps:$4 sm:$0xff]  }
 0x404   :  { %3703 = vmatpush1.bf16.msra.mxu0 %v5057_v26  ;;  %v5138_v26 = vld [vmem:[%s6801_s8 + $0x670] ss:$28 sps:$4 sm:$0xff]  }
 0x405   :  { %3744 = vmatpush1.bf16.msra.mxu1 %v5060_v27  ;;  %3704 = vmatprep.subr.bf16.mxu0 %v5065_v28  ;;  %v5140_v27 = vld [vmem:[%s6801_s8 + $0x4b0] ss:$28 sps:$4 sm:$0xff]   ;;  %v5142_v28 = vld [vmem:[%s6801_s8 + $0x638] ss:$28 sps:$4 sm:$0xff]  }
 0x406   :  { %3745 = vmatprep.subr.bf16.mxu1 %v5068_v29  ;;  %v5143_v29 = vld [vmem:[%s6801_s8 + $0xf8] ss:$28 sps:$4 sm:$0xff]  }
 0x408   :  { %3705 = vmatpush1.bf16.msra.mxu0 %v5063_v30  ;;  %v5144_v30 = vld [vmem:[%s6801_s8 + $0x478] ss:$28 sps:$4 sm:$0xff]  }
 0x409   :  { %3746 = vmatpush1.bf16.msra.mxu1 %v5066_v9  ;;  %3706 = vmatprep.subr.bf16.mxu0 %v5071_v31  ;;  %v5145_v9 = vld [vmem:[%s6801_s8 + $0x280] ss:$28 sps:$4 sm:$0xff]  }
 0x40a   :  { %3747 = vmatprep.subr.bf16.mxu1 %v5074_v32  ;;  %v5146_v31 = vld [vmem:[%s6801_s8 + $0x600] ss:$28 sps:$4 sm:$0xff]  }
 0x40b   :  { %v5147_v32 = vld [vmem:[%s6801_s8 + $0xc0] ss:$28 sps:$4 sm:$0xff]  }
 0x40c   :  { %3707 = vmatpush1.bf16.msra.mxu0 %v5069_v52  ;;  %v5148_v52 = vld [vmem:[%s6801_s8 + $0x440] ss:$28 sps:$4 sm:$0xff]  }
 0x40d   :  { %3748 = vmatpush1.bf16.msra.mxu1 %v5072_v19  ;;  %3708 = vmatprep.subr.bf16.mxu0 %v5077_v34  ;;  %v5149_v19 = vld [vmem:[%s6801_s8 + $0x248] ss:$28 sps:$4 sm:$0xff]  }
 0x40e   :  { %3749 = vmatprep.subr.bf16.mxu1 %v5080_v35  ;;  %v5150_v34 = vld [vmem:[%s6801_s8 + $0x5c8] ss:$28 sps:$4 sm:$0xff]  }
 0x40f   :  { %v5151_v35 = vld [vmem:[%s6801_s8 + $0x88] ss:$28 sps:$4 sm:$0xff]  }
 0x410   :  { %3709 = vmatpush1.bf16.msra.mxu0 %v5075_v8  ;;  %v5152_v8 = vld [vmem:[%s6801_s8 + $0x408] ss:$28 sps:$4 sm:$0xff]  }
 0x411   :  { %3750 = vmatpush1.bf16.msra.mxu1 %v5078_v37  ;;  %3710 = vmatprep.subr.bf16.mxu0 %v5083_v38  ;;  %v5153_v37 = vld [vmem:[%s6801_s8 + $0x210] ss:$28 sps:$4 sm:$0xff]  }
 0x412   :  { %3751 = vmatprep.subr.bf16.mxu1 %v5086_v39  ;;  %v5154_v38 = vld [vmem:[%s6801_s8 + $0x590] ss:$28 sps:$4 sm:$0xff]  }
 0x413   :  { %v5155_v39 = vld [vmem:[%s6801_s8 + $0x50] ss:$28 sps:$4 sm:$0xff]  }
 0x414   :  { %3711 = vmatpush2.bf16.msra.mxu0 %v5081_v36  ;;  %v5156_v36 = vld [vmem:[%s6801_s8 + $0x3d0] ss:$28 sps:$4 sm:$0xff]  }
 0x415   :  { %3752 = vmatpush2.bf16.msra.mxu1 %v5084_v40  ;;  %3712 = vmatprep.subr.bf16.mxu0 %v5089_v41  ;;  %v5157_v40 = vld [vmem:[%s6801_s8 + $0x1d8] ss:$28 sps:$4 sm:$0xff]  }
 0x416   :  { %3753 = vmatprep.subr.bf16.mxu1 %v5092_v42  ;;  %v5158_v41 = vld [vmem:[%s6801_s8 + $0x558] ss:$28 sps:$4 sm:$0xff]  }
 0x417   :  { %v5159_v42 = vld [vmem:[%s6801_s8 + $0x18] ss:$28 sps:$4 sm:$0xff]  }
 0x418   :  { %3713 = vmatpush2.bf16.msra.mxu0 %v5087_v43  ;;  %v5160_v43 = vld [vmem:[%s6801_s8 + $0x398] ss:$28 sps:$4 sm:$0xff]  }
 0x419   :  { %3754 = vmatpush2.bf16.msra.mxu1 %v5090_v44  ;;  %3714 = vmatprep.subr.bf16.mxu0 %v5095_v45  ;;  %v6771_v44 = vld [vmem:[%s6802_s9] sm:$0x7f] }
 0x41a   :  { %3755 = vmatprep.subr.bf16.mxu1 %v5098_v46  ;;  %v2346_v45 = vrot.slane %v6771_v44, %v6025_v6  ;;  %v2350_v46 = vrot.slane %v6771_v44, %v6031_v10 }
 0x41c   :  { %3715 = vmatpush2.bf16.msra.mxu0 %v5093_v47 }
 0x41d   :  { %3756 = vmatpush2.bf16.msra.mxu1 %v5096_v48  ;;  %3716 = vmatprep.subr.bf16.mxu0 %v5101_v49 }
 0x41e   :  { %3757 = vmatprep.subr.bf16.mxu1 %v5104_v50 }
 0x420   :  { %3717 = vmatpush2.bf16.msra.mxu0 %v5099_v51 }
 0x421   :  { %3758 = vmatpush2.bf16.msra.mxu1 %v5102_v53  ;;  %3718 = vmatprep.subr.bf16.mxu0 %v5107_v56 }
 0x422   :  { %3759 = vmatprep.subr.bf16.mxu1 %v5110_v57 }
 0x424   :  { %3719 = vmatpush2.bf16.msra.mxu0 %v5105_v60 }
 0x425   :  { %3760 = vmatpush2.bf16.msra.mxu1 %v5108_v61  ;;  %3720 = vmatprep.subr.bf16.mxu0 %v5113_v62 }
 0x426   :  { %3761 = vmatprep.subr.bf16.mxu1 %v5116_v63 }
 0x428   :  { %3721 = vmatpush2.bf16.msra.mxu0 %v5111_v0 }
 0x429   :  { %3762 = vmatpush2.bf16.msra.mxu1 %v5114_v1  ;;  %3722 = vmatprep.subr.bf16.mxu0 %v5119_v2 }
 0x42a   :  { %3763 = vmatprep.subr.bf16.mxu1 %v5122_v3 }
 0x42c   :  { %3723 = vmatpush2.bf16.msra.mxu0 %v5117_v16 }
 0x42d   :  { %3764 = vmatpush2.bf16.msra.mxu1 %v5120_v4  ;;  %3724 = vmatprep.subr.bf16.mxu0 %v5125_v7  ;;  %v2354_v4 = vrot.slane %v6771_v44, %v6037_v20  ;;  %v2358_v7 = vrot.slane %v6771_v44, %v6040_v33 }
 0x42e   :  { %3765 = vmatprep.subr.bf16.mxu1 %v5128_v11 }
 0x430   :  { %3725 = vmatpush2.bf16.msra.mxu0 %v5123_v12 }
 0x431   :  { %3766 = vmatpush2.bf16.msra.mxu1 %v5126_v13  ;;  %4461 = vmatprep.subr.bf16.mxu0 %v5129_v14 }
 0x432   :  { %4483 = vmatprep.subr.bf16.mxu1 %v5130_v15 }
 0x433   :  { %3727 = vmatmul.mubr.bf16.vlgmr.msra.gmra.mxu0 %v6280_v58 }
 0x434   :  { %3768 = vmatmul.mubr.bf16.vlgmr.msra.gmra.mxu1 %v6282_v59  ;;  %4462 = vmatpush3.bf16.msra.mxu0 %v5131_v17 }
 0x435   :  { %3808 = vmatprep.mubr.bf16.mxu0 %v6270_v54  ;;  %4484 = vmatpush3.bf16.msra.mxu1 %v5132_v18  ;;  %v5139_v54 = vld [vmem:[%s6801_s8 + $0x130] ss:$28 sps:$4 sm:$0xff]  }
 0x436   :  { %3848 = vmatprep.mubr.bf16.mxu1 %v6272_v55  ;;  %4463 = vmatprep.subr.bf16.mxu0 %v5133_v21  ;;  %v5141_v55 = vld [vmem:[%s6801_s8 + $0x2b8] ss:$28 sps:$4 sm:$0xff]   ;;  %s5223_s8 = smov [#allocation4]  }
 0x437   :  { %4485 = vmatprep.subr.bf16.mxu1 %v5134_v22  ;;  %s3936_s9 = sshll.u32 %s5223_s8, 4  ;;  %s3937_s9 = int_to_ptr.vmem [resolvable:$true] %s3936_s9 }
 0x438   :  { %4464 = vmatpush3.bf16.msra.mxu0 %v5135_v23  ;;  %s5177_s26 = scalar_lea.vmem %s3937_s9, 128  ;;  %p5182_p1 = scmp.lt.s32.totalorder %s3937_s9, %s3937_s9 }
 0x439   :  { %4486 = vmatpush3.bf16.msra.mxu1 %v5136_v24  ;;  %4465 = vmatprep.subr.bf16.mxu0 %v5137_v25  ;;  %p5178_p0 = scmp.ne.s32.totalorder %s3937_s9, %s5177_s26  ;;  %p5183_p2 = scmp.lt.s32.totalorder %s5177_s26, %s5177_s26 }
 0x43a   :  { %4487 = vmatprep.subr.bf16.mxu1 %v5138_v26 }
 0x43b   :  { %p5184_p3 = por %p5183_p2, %p5182_p1 }
 0x43c   :  { %4466 = vmatpush3.bf16.msra.mxu0 %v5139_v54 }
 0x43d   :  { %4488 = vmatpush3.bf16.msra.mxu1 %v5140_v27  ;;  %4467 = vmatprep.subr.bf16.mxu0 %v5141_v55  ;;  %p5185_p4 = pnand %p5184_p3, %p5178_p0 }
 0x43e   :  { %4489 = vmatprep.subr.bf16.mxu1 %v5142_v28 }
 0x440   :  { %4468 = vmatpush3.bf16.msra.mxu0 %v5143_v29 }
 0x441   :  { %4490 = vmatpush3.bf16.msra.mxu1 %v5144_v30  ;;  %4469 = vmatprep.subr.bf16.mxu0 %v5145_v9 }
 0x442   :  { %4491 = vmatprep.subr.bf16.mxu1 %v5146_v31 }
 0x444   :  { %4470 = vmatpush3.bf16.msra.mxu0 %v5147_v32 }
 0x445   :  { %4492 = vmatpush3.bf16.msra.mxu1 %v5148_v52  ;;  %4471 = vmatprep.subr.bf16.mxu0 %v5149_v19 }
 0x446   :  { %4493 = vmatprep.subr.bf16.mxu1 %v5150_v34 }
 0x448   :  { %4472 = vmatpush3.bf16.msra.mxu0 %v5151_v35 }
 0x449   :  { %4494 = vmatpush3.bf16.msra.mxu1 %v5152_v8  ;;  %4473 = vmatprep.subr.bf16.mxu0 %v5153_v37 }
 0x44a   :  { %4495 = vmatprep.subr.bf16.mxu1 %v5154_v38 }
 0x44c   :  { %4474 = vmatpush3.bf16.msra.mxu0 %v5155_v39 }
 0x44d   :  { %4496 = vmatpush3.bf16.msra.mxu1 %v5156_v36  ;;  %4475 = vmatprep.subr.bf16.mxu0 %v5157_v40 }
 0x44e   :  { %4497 = vmatprep.subr.bf16.mxu1 %v5158_v41 }
 0x450   :  { %4476 = vmatpush3.bf16.msra.mxu0 %v5159_v42 }
 0x451   :  { %4498 = vmatpush3.bf16.msra.mxu1 %v5160_v43 }
 0x453   :  { %3809 = vmatmul.mubr.bf16.vlgmr.msra.gmra.mxu0 %v6280_v58 }
 0x454   :  { %3849 = vmatmul.mubr.bf16.vlgmr.msra.gmra.mxu1 %v6282_v59 }
 0x473   :  { %v3564_v47 = vpop.f32.mrf.mxu0  ;;  %v3605_v48 = vpop.f32.mrf.mxu1 }
 0x474   :  { %v3565_v49 = vadd.f32 %v3564_v47, %v2346_v45 }
 0x475   :  { %v3566_v50 = vpop.f32.mrf.mxu0  ;;  %v3607_v51 = vpop.f32.mrf.mxu1 }
 0x476   :  { %v3606_v53 = vadd.f32 %v3605_v48, %v3565_v49  ;;  %v3567_v58 = vadd.f32 %v3566_v50, %v2350_v46 }
 0x477   :  { %v3568_v56 = vpop.f32.mrf.mxu0  ;;  %v3609_v59 = vpop.f32.mrf.mxu1 }
 0x478   :  { %v3856_v57 = vmul.f32 0.5, %v3606_v53  ;;  %v3608_v60 = vadd.f32 %v3607_v51, %v3567_v58 }
 0x479   :  { %v3569_v61 = vpop.f32.mrf.mxu0  ;;  %v3610_v62 = vpop.f32.mrf.mxu1 }
 0x47a   :  { %5163 = vtanh.f32 %v3856_v57  ;;  %v3857_v63 = vmul.f32 0.5, %v3608_v60 }
 0x47c   :  { %5165 = vtanh.f32 %v3857_v63 }
 0x487   :  { %v5164_v6 = vpop.eup %5163 }
 0x488   :  { %v3870_v0 = vmul.f32 0.5, %v5164_v6 }
 0x489   :  { %v5166_v1 = vpop.eup %5165 }
 0x48a   :  { %v3871_v10 = vmul.f32 0.5, %v5166_v1  ;;  %v3877_v2 = vadd.f32 0.5, %v3870_v0 }
 0x48c   :  { %v3878_v3 = vadd.f32 0.5, %v3871_v10 }
 0x48e   :  { %v4413_v16 = vpack.c.bf16 %v3878_v3, %v3877_v2 }
 0x490   :  { %3913 = vst [vmem:[#allocation2] sm:$0xff] %v4413_v16 }
 0x4b3   :  { %v3646_v11 = vpop.f32.mrf.mxu0  ;;  %v3687_v12 = vpop.f32.mrf.mxu1 }
 0x4b4   :  { %v3647_v13 = vadd.f32 %v3646_v11, %v2354_v4 }
 0x4b5   :  { %v3648_v14 = vpop.f32.mrf.mxu0  ;;  %v3689_v15 = vpop.f32.mrf.mxu1 }
 0x4b6   :  { %5188 = shalt.err (!%p5185_p4)
}
 0x4b7   :  { %3939 = dma.vmem_to_hbm [thread:$0]  %s3937_s9, 128, %s6804_s11, [#allocation5]   ;;  %v3688_v20 = vadd.f32 %v3687_v12, %v3647_v13  ;;  %v3649_v33 = vadd.f32 %v3648_v14, %v2358_v7  ;;  %v3650_v17 = vpop.f32.mrf.mxu0  ;;  %v3691_v18 = vpop.f32.mrf.mxu1  ;;  %v2361_v9 = vsub.s32 4, %v6022_v5  ;;  %v2365_v31 = vsub.s32 5, %v6022_v5 }
 0x4b8   :  { %v2369_v56 = vsub.s32 6, %v6022_v5  ;;  %s5224_s11 = smov [#allocation2]   ;;  %vm3916_vm2 = vcmask 125952  }
 0x4b9   :  { %v3858_v21 = vmul.f32 0.5, %v3688_v20  ;;  %v3690_v22 = vadd.f32 %v3689_v15, %v3649_v33  ;;  %v3651_v23 = vpop.f32.mrf.mxu0  ;;  %v3692_v24 = vpop.f32.mrf.mxu1  ;;  %v2362_v32 = vrot.slane %v6771_v44, %v2361_v9  ;;  %v2366_v52 = vrot.slane %v6771_v44, %v2365_v31  ;;  %s3926_s29 = sshll.u32 %s5224_s11, 4  ;;  %s3927_s29 = int_to_ptr.vmem [resolvable:$true] %s3926_s29 }
 0x4ba   :  { %v2370_v60 = vrot.slane %v6771_v44, %v2369_v56  ;;  %s5197_s30 = scalar_lea.vmem %s3927_s29, 448  ;;  %p5202_p6 = scmp.lt.s32.totalorder %s3927_s29, %s3927_s29 }
 0x4bb   :  { %5167 = vtanh.f32 %v3858_v21  ;;  %v3859_v25 = vmul.f32 0.5, %v3690_v22  ;;  %p5198_p5 = scmp.ne.s32.totalorder %s3927_s29, %s5197_s30  ;;  %p5203_p7 = scmp.lt.s32.totalorder %s5197_s30, %s5197_s30 }
 0x4bd   :  { %5169 = vtanh.f32 %v3859_v25  ;;  %p5204_p8 = por %p5203_p7, %p5202_p6 }
 0x4bf   :  { %p5205_p9 = pnand %p5204_p8, %p5198_p5 }
 0x4c8   :  { %v5168_v26 = vpop.eup %5167 }
 0x4c9   :  { %v3872_v54 = vmul.f32 0.5, %v5168_v26 }
 0x4ca   :  { %v5170_v27 = vpop.eup %5169 }
 0x4cb   :  { %v3873_v55 = vmul.f32 0.5, %v5170_v27  ;;  %v3879_v28 = vadd.f32 0.5, %v3872_v54 }
 0x4cd   :  { %v3880_v29 = vadd.f32 0.5, %v3873_v55 }
 0x4cf   :  { %v4414_v30 = vpack.c.bf16 %v3880_v29, %v3879_v28 }
 0x4d1   :  { %3914 = vst [vmem:[#allocation2 + $0x8] sm:$0xff] %v4414_v30 }
 0x4f3   :  { %v3728_v19 = vpop.f32.mrf.mxu0 }
 0x4f4   :  { %v3729_v34 = vadd.f32 %v3728_v19, %v2362_v32  ;;  %v3769_v35 = vpop.f32.mrf.mxu1 }
 0x4f5   :  { %v3730_v8 = vpop.f32.mrf.mxu0 }
 0x4f6   :  { %v3770_v37 = vadd.f32 %v3769_v35, %v3729_v34  ;;  %v3731_v38 = vadd.f32 %v3730_v8, %v2366_v52  ;;  %v3771_v39 = vpop.f32.mrf.mxu1 }
 0x4f7   :  { %v3732_v36 = vpop.f32.mrf.mxu0 }
 0x4f8   :  { %v3860_v40 = vmul.f32 0.5, %v3770_v37  ;;  %v3772_v41 = vadd.f32 %v3771_v39, %v3731_v38  ;;  %v3773_v42 = vpop.f32.mrf.mxu1 }
 0x4f9   :  { %v3733_v43 = vpop.f32.mrf.mxu0 }
 0x4fa   :  { %5171 = vtanh.f32 %v3860_v40  ;;  %v3861_v45 = vmul.f32 0.5, %v3772_v41  ;;  %v3774_v46 = vpop.f32.mrf.mxu1 }
 0x4fc   :  { %5173 = vtanh.f32 %v3861_v45 }
 0x507   :  { %v5172_v47 = vpop.eup %5171 }
 0x508   :  { %v3874_v48 = vmul.f32 0.5, %v5172_v47 }
 0x509   :  { %v5174_v49 = vpop.eup %5173 }
 0x50a   :  { %v3875_v50 = vmul.f32 0.5, %v5174_v49  ;;  %v3881_v51 = vadd.f32 0.5, %v3874_v48 }
 0x50c   :  { %v3882_v53 = vadd.f32 0.5, %v3875_v50 }
 0x50e   :  { %v4415_v58 = vpack.c.bf16 %v3882_v53, %v3881_v51 }
 0x510   :  { %3915 = vst [vmem:[#allocation2 + $0x10] sm:$0xff] %v4415_v58 }
 0x513   :  { %v4477_v59 = vpop.f32.mrf.mxu0 }
 0x514   :  { %v4499_v57 = vpop.f32.mrf.mxu1 }
 0x515   :  { %v4478_v61 = vpop.f32.mrf.mxu0 }
 0x516   :  { %v4479_v62 = vadd.f32 %v4478_v61, %v4477_v59  ;;  %v4500_v63 = vpop.f32.mrf.mxu1 }
 0x517   :  { %v4480_v6 = vpop.f32.mrf.mxu0  ;;  %v4501_v1 = vadd.f32 %v4500_v63, %v4499_v57 }
 0x518   :  { %v3811_v0 = vadd.f32 %v4479_v62, %v2370_v60  ;;  %v4502_v10 = vpop.f32.mrf.mxu1 }
 0x519   :  { %v4481_v2 = vpop.f32.mrf.mxu0 }
 0x51a   :  { %v3851_v3 = vadd.f32 %v4501_v1, %v3811_v0  ;;  %v4503_v16 = vpop.f32.mrf.mxu1 }
 0x51c   :  { %v3862_v4 = vmul.f32 0.5, %v3851_v3 }
 0x51e   :  { %5175 = vtanh.f32 %v3862_v4 }
 0x52b   :  { %v5176_v7 = vpop.eup %5175 }
 0x52c   :  { %v3876_v11 = vmul.f32 0.5, %v5176_v7 }
 0x52e   :  { %v3883_v5 = vadd.f32 0.5, %v3876_v11 }
 0x530   :  { %v4416_v12 = vpack.c.bf16 %v3883_v5, %v3883_v5 }
 0x532   :  { %3917 = vst.msk [vmem:[#allocation2 + $0x18] sm:$0xf] %vm3916_vm2, %v4416_v12 }
 0x533   :  { %5208 = shalt.err (!%p5205_p9)
}
 0x534   :  { %3929 = dma.vmem_to_hbm [thread:$0]  %s3927_s29, 448, %s6803_s10, [#allocation3]  }
 0x535   :  { %5217 = dma.done.wait [#allocation3], 448  }
 0x536   :  { %5218 = vsyncadd [#allocation3], 4294966848 }
 0x537   :  { %5219 = dma.done.wait [#allocation5], 128  }
 0x538   :  { %5220 = vsyncadd [#allocation5], 4294967168 }
 0x539   :  { %3946 = vsyncpa [#allocation3], 1 }
 0x53a   :  { %3947 = vsyncpa [#allocation5], 1 }

</bundles_post_ra>
